<compile_context>
chip_gen: v7x
topology: tpu7x:2x2x1
jax: 0.10.0
libtpu: 0.0.40
codegen_flags: <defaults>
</compile_context>

<pallas_src>
import functools

import jax
import jax.numpy as jnp
from jax.experimental import pallas as pl
from jax.experimental.pallas import tpu as pltpu

MATMUL_DTYPE = jnp.bfloat16  # MXU operand dtype; accumulation/carries stay f32


def sentiment_lstm_kernel(emb_ref,                   # (TC*B, E)  bf16 streamed chunk
                          wx_ref,                    # (E, 4H)    bf16  W_ih0^T
                          wbig_ref,                  # (2H, 8H)   bf16  [[Whh0^T, Wih1^T],[0, Whh1^T]]
                          b0_ref, b1_ref,            # (1, 4H) f32 each
                          h0_ref, c0_ref,            # (2, B, H) f32 initial hidden / cell
                          fcw_ref, fcb_ref,          # (1, H), (1, 1) f32
                          out_ref, hn_ref, cn_ref,   # (B, 1), (2, B, H), (2, B, H)
                          *scratch,                  # multi-chunk only: (h_sc, c_sc)
                          single_chunk: bool):
    B = h0_ref.shape[1]
    H = h0_ref.shape[2]
    H4 = 4 * H
    TC = emb_ref.shape[0] // B

    if single_chunk:
        h0, h1 = h0_ref[0], h0_ref[1]
        c0, c1 = c0_ref[0], c0_ref[1]
    else:
        h_sc, c_sc = scratch

        @pl.when(pl.program_id(0) == 0)
        def _():
            h_sc[...] = h0_ref[...]
            c_sc[...] = c0_ref[...]

        h0, h1 = h_sc[0], h_sc[1]
        c0, c1 = c_sc[0], c_sc[1]

    # Hoisted layer-0 input projection for the whole chunk; kept in vregs and sliced
    # per step with static slices (no scratch round-trip).
    xp = jnp.dot(emb_ref[...], wx_ref[...], preferred_element_type=jnp.float32)  # (TC*B, 4H)

    wbig = wbig_ref[...]
    b0 = b0_ref[...]
    b1 = b1_ref[...]

    def cell(sg, th, c_prev):
        # PyTorch gate order i, f, g, o on a 4H-wide slab of sigmoid/tanh results.
        c_new = sg[:, H:2 * H] * c_prev + sg[:, 0:H] * th[:, 2 * H:3 * H]
        h_new = sg[:, 3 * H:4 * H] * jnp.tanh(c_new)
        return h_new, c_new

    # Prologue: layer-0 pre-activation for the chunk's first step.
    # (The layer-1 half of this matmul output is unused.)
    m = jnp.dot(jnp.concatenate([h0, h1], axis=-1).astype(wbig.dtype), wbig,
                preferred_element_type=jnp.float32)
    g0pre = xp[0:B] + m[:, :H4] + b0

    g1pre = None
    for t in range(TC):
        if g1pre is None:
            # First pipelined step: only layer 0 has a pending pre-activation.
            sg = jax.nn.sigmoid(g0pre)
            th = jnp.tanh(g0pre)
            h0, c0 = cell(sg, th, c0)
        else:
            # Combined (B, 8H) activation: [layer-0 step t | layer-1 step t-1].
            g = jnp.concatenate([g0pre, g1pre], axis=-1)
            sg = jax.nn.sigmoid(g)
            th = jnp.tanh(g)
            h0, c0 = cell(sg[:, :H4], th[:, :H4], c0)
            h1, c1 = cell(sg[:, H4:], th[:, H4:], c1)

        # Single fused recurrent matmul per timestep:
        # [h0[t] | h1[t-1]] @ [[Whh0^T, Wih1^T], [0, Whh1^T]] -> (B, 8H)
        lhs = jnp.concatenate([h0, h1], axis=-1).astype(wbig.dtype)
        m = jnp.dot(lhs, wbig, preferred_element_type=jnp.float32)
        g1pre = m[:, H4:] + b1                                  # layer-1 gates, step t
        if t + 1 < TC:
            g0pre = xp[(t + 1) * B:(t + 2) * B] + m[:, :H4] + b0  # layer-0 gates, step t+1

    # Epilogue: finish layer 1 for the chunk's last step.
    sg = jax.nn.sigmoid(g1pre)
    th = jnp.tanh(g1pre)
    h1, c1 = cell(sg, th, c1)

    def write_outputs():
        hn_ref[0] = h0
        hn_ref[1] = h1
        cn_ref[0] = c0
        cn_ref[1] = c1
        # FC head (output_dim=1): VPU broadcast-mul + lane reduce, off the MXU path.
        logits = jnp.sum(h1 * fcw_ref[...], axis=-1, keepdims=True) + fcb_ref[...]
        out_ref[...] = jax.nn.sigmoid(logits)

    if single_chunk:
        write_outputs()
    else:
        h_sc[0] = h0
        h_sc[1] = h1
        c_sc[0] = c0
        c_sc[1] = c1

        @pl.when(pl.program_id(0) == pl.num_programs(0) - 1)
        def _():
            write_outputs()


def _pick_time_chunk(T, B_pad, E):
    # Whole sequence in one grid step unless the streamed embedding chunk would get
    # large; cap the (double-buffered) chunk at ~4 MiB so the design also fits
    # comfortably inside v7x's 64 MiB VMEM at big T.
    per_step_bytes = B_pad * E * 2  # bf16
    max_tc = max(1, (4 * 1024 * 1024) // per_step_bytes)
    if T <= max_tc:
        return T
    tc = 1
    for cand in range(max_tc, 0, -1):
        if T % cand == 0:
            tc = cand
            break
    return tc


def make_params(key, vocab_size, embedding_dim, hidden_dim, output_dim):
    ks = jax.random.split(key, 12)
    s = 0.1
    H, E = hidden_dim, embedding_dim
    return {
        "embedding": jax.random.normal(ks[0], (vocab_size, E), jnp.float32) * s,
        # layer 0
        "w_ih0": jax.random.normal(ks[1], (4 * H, E), jnp.float32) * s,
        "w_hh0": jax.random.normal(ks[2], (4 * H, H), jnp.float32) * s,
        "b_ih0": jax.random.normal(ks[3], (4 * H,), jnp.float32) * s,
        "b_hh0": jax.random.normal(ks[4], (4 * H,), jnp.float32) * s,
        # layer 1
        "w_ih1": jax.random.normal(ks[5], (4 * H, H), jnp.float32) * s,
        "w_hh1": jax.random.normal(ks[6], (4 * H, H), jnp.float32) * s,
        "b_ih1": jax.random.normal(ks[7], (4 * H,), jnp.float32) * s,
        "b_hh1": jax.random.normal(ks[8], (4 * H,), jnp.float32) * s,
        # fc
        "fc_w": jax.random.normal(ks[9], (output_dim, H), jnp.float32) * s,
        "fc_b": jax.random.normal(ks[10], (output_dim,), jnp.float32) * s,
    }


def sentiment_rnn_forward(x_ids, hidden, params, *, time_chunk=None):
    """x_ids: (B, T) int32 token ids; hidden = (h0, c0) each (num_layers=2, B, H)."""
    h0, c0 = hidden
    B, T = x_ids.shape
    H = h0.shape[-1]
    E = params["embedding"].shape[1]

    # bf16 packs 2 rows per sublane -> pad the batch to 16 so per-step matmul LHS
    # tiles are fully populated (v5e); extra padded rows are free at these sizes.
    B_pad = max(16, ((B + 15) // 16) * 16)
    pad = B_pad - B

    # Time-major embedding gather (no separate (B,T,E)->(T,B,E) transpose pass).
    emb_t = params["embedding"][x_ids.T]                          # (T, B, E)
    if pad:
        emb_t = jnp.pad(emb_t, ((0, 0), (0, pad), (0, 0)))
        h0 = jnp.pad(h0, ((0, 0), (0, pad), (0, 0)))
        c0 = jnp.pad(c0, ((0, 0), (0, pad), (0, 0)))
    emb_flat = emb_t.reshape(T * B_pad, E).astype(MATMUL_DTYPE)   # rows ordered [t, b]

    if time_chunk is None:
        tc = _pick_time_chunk(T, B_pad, E)
    else:
        tc = 1
        for cand in range(min(T, int(time_chunk)), 0, -1):
            if T % cand == 0:
                tc = cand
                break
    n_chunks = T // tc
    rows = tc * B_pad
    single = (n_chunks == 1)

    # Pre-transposed / stacked weights so all kernel matmuls are (rows, K) @ (K, N).
    wx = params["w_ih0"].T.astype(MATMUL_DTYPE)                   # (E, 4H)
    b0 = (params["b_ih0"] + params["b_hh0"]).reshape(1, 4 * H).astype(jnp.float32)
    b1 = (params["b_ih1"] + params["b_hh1"]).reshape(1, 4 * H).astype(jnp.float32)
    # Fused recurrent weight: [h0 | h1] @ wbig = [h0 @ Whh0^T | h0 @ Wih1^T + h1 @ Whh1^T]
    wbig = jnp.concatenate(
        [jnp.concatenate([params["w_hh0"].T, params["w_ih1"].T], axis=1),
         jnp.concatenate([jnp.zeros((H, 4 * H), jnp.float32), params["w_hh1"].T], axis=1)],
        axis=0).astype(MATMUL_DTYPE)                              # (2H, 8H)
    fcw = params["fc_w"].reshape(1, H).astype(jnp.float32)        # (1, H)
    fcb = params["fc_b"].reshape(1, 1).astype(jnp.float32)        # (1, 1)

    # Advisory cost estimate for XLA scheduling around the custom call.
    flops = int(2 * T * B_pad * (E * 4 * H + 2 * H * 8 * H)
                + 2 * n_chunks * B_pad * 2 * H * 8 * H)
    transc = int(T * B_pad * (2 * 8 * H + 2 * H) + B_pad)
    bytes_acc = int(
        emb_flat.size * emb_flat.dtype.itemsize
        + sum(int(a.size) * a.dtype.itemsize
              for a in (wx, wbig, b0, b1, h0, c0, fcw, fcb))
        + (B_pad + 4 * B_pad * H) * 4)

    scratch_shapes = [] if single else [pltpu.VMEM((2, B_pad, H), jnp.float32),
                                        pltpu.VMEM((2, B_pad, H), jnp.float32)]

    grid_spec = pltpu.PrefetchScalarGridSpec(
        num_scalar_prefetch=0,
        grid=(n_chunks,),
        in_specs=[
            pl.BlockSpec((rows, E), lambda t: (t, 0)),            # streamed emb chunk
            pl.BlockSpec((E, 4 * H), lambda t: (0, 0)),           # resident weights
            pl.BlockSpec((2 * H, 8 * H), lambda t: (0, 0)),
            pl.BlockSpec((1, 4 * H), lambda t: (0, 0)),
            pl.BlockSpec((1, 4 * H), lambda t: (0, 0)),
            pl.BlockSpec((2, B_pad, H), lambda t: (0, 0, 0)),
            pl.BlockSpec((2, B_pad, H), lambda t: (0, 0, 0)),
            pl.BlockSpec((1, H), lambda t: (0, 0)),
            pl.BlockSpec((1, 1), lambda t: (0, 0)),
        ],
        out_specs=(
            pl.BlockSpec((B_pad, 1), lambda t: (0, 0)),
            pl.BlockSpec((2, B_pad, H), lambda t: (0, 0, 0)),
            pl.BlockSpec((2, B_pad, H), lambda t: (0, 0, 0)),
        ),
        scratch_shapes=scratch_shapes,
    )

    kernel = functools.partial(sentiment_lstm_kernel, single_chunk=single)

    out, hn, cn = pl.pallas_call(
        kernel,
        out_shape=(
            jax.ShapeDtypeStruct((B_pad, 1), jnp.float32),
            jax.ShapeDtypeStruct((2, B_pad, H), jnp.float32),
            jax.ShapeDtypeStruct((2, B_pad, H), jnp.float32),
        ),
        grid_spec=grid_spec,
        compiler_params=pltpu.CompilerParams(
            dimension_semantics=("arbitrary",),                   # sequential time carry
            vmem_limit_bytes=32 * 1024 * 1024),
        cost_estimate=pl.CostEstimate(flops=flops, transcendentals=transc,
                                      bytes_accessed=bytes_acc),
    )(emb_flat, wx, wbig, b0, b1, h0, c0, fcw, fcb)

    # Reference takes sigmoid(fc(.)) over all timesteps then keeps the last one;
    # for output_dim=1 that equals sigmoid(fc(h_top at t=T-1)), computed in-kernel.
    return out[:B, 0], (hn[:, :B], cn[:, :B])


def reference_forward(x_ids, hidden, params):
    """Pure-JAX f32 reference of SentimentRNN.forward (dropout as identity / eval)."""
    h, c = hidden
    h0, h1 = h[0], h[1]
    c0, c1 = c[0], c[1]
    emb = params["embedding"][x_ids]                              # (B, T, E)
    T = emb.shape[1]

    def cell(g, c_prev):
        i, f, gg, o = jnp.split(g, 4, axis=-1)
        i, f, o = jax.nn.sigmoid(i), jax.nn.sigmoid(f), jax.nn.sigmoid(o)
        gg = jnp.tanh(gg)
        c_new = f * c_prev + i * gg
        return o * jnp.tanh(c_new), c_new

    for t in range(T):
        x = emb[:, t]
        g0 = (x @ params["w_ih0"].T + h0 @ params["w_hh0"].T
              + params["b_ih0"] + params["b_hh0"])
        h0, c0 = cell(g0, c0)
        g1 = (h0 @ params["w_ih1"].T + h1 @ params["w_hh1"].T
              + params["b_ih1"] + params["b_hh1"])
        h1, c1 = cell(g1, c1)

    logits = h1 @ params["fc_w"].T + params["fc_b"]
    sig = jax.nn.sigmoid(logits)
    return sig[:, -1], (jnp.stack([h0, h1]), jnp.stack([c0, c1]))


if __name__ == "__main__":
    # Small shapes consistent with the module: batch=2, seq=8, embed=64, hidden=32.
    vocab_size = 50
    embedding_dim = 64
    hidden_dim = 32
    no_layers = 2
    output_dim = 1
    B, T = 2, 8

    key = jax.random.PRNGKey(0)
    k_param, k_x = jax.random.split(key)

    params = make_params(k_param, vocab_size, embedding_dim, hidden_dim, output_dim)
    x_ids = jax.random.randint(k_x, (B, T), 0, vocab_size, dtype=jnp.int32)

    # init_hidden: zeros of shape (no_layers, B, H)
    h0 = jnp.zeros((no_layers, B, hidden_dim), jnp.float32)
    c0 = jnp.zeros((no_layers, B, hidden_dim), jnp.float32)

    fwd = jax.jit(functools.partial(sentiment_rnn_forward, params=params))
    sig_out, (hn, cn) = fwd(x_ids, (h0, c0))
    jax.block_until_ready((sig_out, hn, cn))

    assert sig_out.shape == (B,)
    assert hn.shape == (no_layers, B, hidden_dim)
    assert cn.shape == (no_layers, B, hidden_dim)

    # Correctness vs. pure-JAX f32 reference (kernel uses bf16 MXU operands).
    ref_out, (ref_hn, ref_cn) = reference_forward(x_ids, (h0, c0), params)
    assert jnp.allclose(sig_out, ref_out, rtol=2e-2, atol=2e-2)
    assert jnp.allclose(hn, ref_hn, rtol=2e-2, atol=2e-2)
    assert jnp.allclose(cn, ref_cn, rtol=2e-2, atol=2e-2)

    print("KERNEL_OK")
</pallas_src>

<mosaic_0001>
module attributes {stable_mosaic.version = 11 : i64} {
  func.func @sentiment_lstm_kernel(%arg0: i32, %arg1: memref<128x64xbf16, #tpu.memory_space<vmem>>, %arg2: memref<64x128xbf16, #tpu.memory_space<vmem>>, %arg3: memref<64x256xbf16, #tpu.memory_space<vmem>>, %arg4: memref<1x128xf32, #tpu.memory_space<vmem>>, %arg5: memref<1x128xf32, #tpu.memory_space<vmem>>, %arg6: memref<2x16x32xf32, #tpu.memory_space<vmem>>, %arg7: memref<2x16x32xf32, #tpu.memory_space<vmem>>, %arg8: memref<1x32xf32, #tpu.memory_space<vmem>>, %arg9: memref<1x1xf32, #tpu.memory_space<vmem>>, %arg10: memref<16x1xf32, #tpu.memory_space<vmem>>, %arg11: memref<2x16x32xf32, #tpu.memory_space<vmem>>, %arg12: memref<2x16x32xf32, #tpu.memory_space<vmem>>) attributes {dimension_semantics = [#tpu.dimension_semantics<arbitrary>], iteration_bounds = array<i64: 1>, scalar_prefetch = 0 : i64, scratch_operands = 0 : i64, tpu.core_type = #tpu.core_type<tc>, window_params = [{transform_indices = @transform_0, window_bounds = array<i64: 128, 64>}, {pipeline_mode = #tpu.pipeline_mode<synchronous>, transform_indices = @transform_1, window_bounds = array<i64: 64, 128>}, {pipeline_mode = #tpu.pipeline_mode<synchronous>, transform_indices = @transform_2, window_bounds = array<i64: 64, 256>}, {pipeline_mode = #tpu.pipeline_mode<synchronous>, transform_indices = @transform_3, window_bounds = array<i64: 1, 128>}, {pipeline_mode = #tpu.pipeline_mode<synchronous>, transform_indices = @transform_4, window_bounds = array<i64: 1, 128>}, {pipeline_mode = #tpu.pipeline_mode<synchronous>, transform_indices = @transform_5, window_bounds = array<i64: 2, 16, 32>}, {pipeline_mode = #tpu.pipeline_mode<synchronous>, transform_indices = @transform_6, window_bounds = array<i64: 2, 16, 32>}, {pipeline_mode = #tpu.pipeline_mode<synchronous>, transform_indices = @transform_7, window_bounds = array<i64: 1, 32>}, {pipeline_mode = #tpu.pipeline_mode<synchronous>, transform_indices = @transform_8, window_bounds = array<i64: 1, 1>}, {pipeline_mode = #tpu.pipeline_mode<synchronous>, transform_indices = @transform_9, window_bounds = array<i64: 16, 1>}, {pipeline_mode = #tpu.pipeline_mode<synchronous>, transform_indices = @transform_10, window_bounds = array<i64: 2, 16, 32>}, {pipeline_mode = #tpu.pipeline_mode<synchronous>, transform_indices = @transform_11, window_bounds = array<i64: 2, 16, 32>}]} {
    %c0 = arith.constant 0 : index
    %c0_0 = arith.constant 0 : index
    %c0_1 = arith.constant 0 : index
    %0 = vector.load %arg6[%c0, %c0_0, %c0_1] : memref<2x16x32xf32, #tpu.memory_space<vmem>>, vector<1x16x32xf32>
    %1 = vector.shape_cast %0 : vector<1x16x32xf32> to vector<16x32xf32>
    %c1 = arith.constant 1 : index
    %c0_2 = arith.constant 0 : index
    %c0_3 = arith.constant 0 : index
    %2 = vector.load %arg6[%c1, %c0_2, %c0_3] : memref<2x16x32xf32, #tpu.memory_space<vmem>>, vector<1x16x32xf32>
    %3 = vector.shape_cast %2 : vector<1x16x32xf32> to vector<16x32xf32>
    %c0_4 = arith.constant 0 : index
    %c0_5 = arith.constant 0 : index
    %c0_6 = arith.constant 0 : index
    %4 = vector.load %arg7[%c0_4, %c0_5, %c0_6] : memref<2x16x32xf32, #tpu.memory_space<vmem>>, vector<1x16x32xf32>
    %5 = vector.shape_cast %4 : vector<1x16x32xf32> to vector<16x32xf32>
    %c1_7 = arith.constant 1 : index
    %c0_8 = arith.constant 0 : index
    %c0_9 = arith.constant 0 : index
    %6 = vector.load %arg7[%c1_7, %c0_8, %c0_9] : memref<2x16x32xf32, #tpu.memory_space<vmem>>, vector<1x16x32xf32>
    %7 = vector.shape_cast %6 : vector<1x16x32xf32> to vector<16x32xf32>
    %c0_10 = arith.constant 0 : index
    %c0_11 = arith.constant 0 : index
    %8 = vector.load %arg1[%c0_10, %c0_11] : memref<128x64xbf16, #tpu.memory_space<vmem>>, vector<128x64xbf16>
    %c0_12 = arith.constant 0 : index
    %c0_13 = arith.constant 0 : index
    %9 = vector.load %arg2[%c0_12, %c0_13] : memref<64x128xbf16, #tpu.memory_space<vmem>>, vector<64x128xbf16>
    %cst = arith.constant dense<0.000000e+00> : vector<128x128xf32>
    %10 = tpu.matmul %8, %9, %cst {dimension_numbers = #tpu.dot_dimension_numbers<[1], [0], [0], [1], [0, 0, 1, 1], [], []>} : vector<128x64xbf16>, vector<64x128xbf16>, vector<128x128xf32> -> vector<128x128xf32>
    %c0_14 = arith.constant 0 : index
    %c0_15 = arith.constant 0 : index
    %11 = vector.load %arg3[%c0_14, %c0_15] : memref<64x256xbf16, #tpu.memory_space<vmem>>, vector<64x256xbf16>
    %c0_16 = arith.constant 0 : index
    %c0_17 = arith.constant 0 : index
    %12 = vector.load %arg4[%c0_16, %c0_17] : memref<1x128xf32, #tpu.memory_space<vmem>>, vector<1x128xf32>
    %c0_18 = arith.constant 0 : index
    %c0_19 = arith.constant 0 : index
    %13 = vector.load %arg5[%c0_18, %c0_19] : memref<1x128xf32, #tpu.memory_space<vmem>>, vector<1x128xf32>
    %14 = tpu.concatenate %1, %3 in 1 : vector<16x32xf32>, vector<16x32xf32> -> vector<16x64xf32>
    %15 = arith.truncf %14 : vector<16x64xf32> to vector<16x64xbf16>
    %cst_20 = arith.constant dense<0.000000e+00> : vector<16x256xf32>
    %16 = tpu.matmul %15, %11, %cst_20 {dimension_numbers = #tpu.dot_dimension_numbers<[1], [0], [0], [1], [0, 0, 1, 1], [], []>} : vector<16x64xbf16>, vector<64x256xbf16>, vector<16x256xf32> -> vector<16x256xf32>
    %17 = vector.extract_strided_slice %10 {offsets = [0, 0], sizes = [16, 128], strides = [1, 1]} : vector<128x128xf32> to vector<16x128xf32>
    %18 = vector.extract_strided_slice %16 {offsets = [0, 0], sizes = [16, 128], strides = [1, 1]} : vector<16x256xf32> to vector<16x128xf32>
    %19 = arith.addf %17, %18 : vector<16x128xf32>
    %20 = vector.broadcast %12 : vector<1x128xf32> to vector<16x128xf32>
    %21 = arith.addf %19, %20 : vector<16x128xf32>
    %22 = arith.negf %21 : vector<16x128xf32>
    %23 = math.exp %22 : vector<16x128xf32>
    %cst_21 = arith.constant 1.000000e+00 : f32
    %24 = vector.broadcast %cst_21 : f32 to vector<16x128xf32>
    %25 = arith.addf %24, %23 : vector<16x128xf32>
    %26 = arith.divf %24, %25 : vector<16x128xf32>
    %27 = math.tanh %21 : vector<16x128xf32>
    %28 = vector.extract_strided_slice %26 {offsets = [0, 32], sizes = [16, 32], strides = [1, 1]} : vector<16x128xf32> to vector<16x32xf32>
    %29 = arith.mulf %28, %5 : vector<16x32xf32>
    %30 = vector.extract_strided_slice %26 {offsets = [0, 0], sizes = [16, 32], strides = [1, 1]} : vector<16x128xf32> to vector<16x32xf32>
    %31 = vector.extract_strided_slice %27 {offsets = [0, 64], sizes = [16, 32], strides = [1, 1]} : vector<16x128xf32> to vector<16x32xf32>
    %32 = arith.mulf %30, %31 : vector<16x32xf32>
    %33 = arith.addf %29, %32 : vector<16x32xf32>
    %34 = vector.extract_strided_slice %26 {offsets = [0, 96], sizes = [16, 32], strides = [1, 1]} : vector<16x128xf32> to vector<16x32xf32>
    %35 = math.tanh %33 : vector<16x32xf32>
    %36 = arith.mulf %34, %35 : vector<16x32xf32>
    %37 = tpu.concatenate %36, %3 in 1 : vector<16x32xf32>, vector<16x32xf32> -> vector<16x64xf32>
    %38 = arith.truncf %37 : vector<16x64xf32> to vector<16x64xbf16>
    %cst_22 = arith.constant dense<0.000000e+00> : vector<16x256xf32>
    %39 = tpu.matmul %38, %11, %cst_22 {dimension_numbers = #tpu.dot_dimension_numbers<[1], [0], [0], [1], [0, 0, 1, 1], [], []>} : vector<16x64xbf16>, vector<64x256xbf16>, vector<16x256xf32> -> vector<16x256xf32>
    %40 = vector.extract_strided_slice %39 {offsets = [0, 128], sizes = [16, 128], strides = [1, 1]} : vector<16x256xf32> to vector<16x128xf32>
    %41 = vector.broadcast %13 : vector<1x128xf32> to vector<16x128xf32>
    %42 = arith.addf %40, %41 : vector<16x128xf32>
    %43 = vector.extract_strided_slice %10 {offsets = [16, 0], sizes = [16, 128], strides = [1, 1]} : vector<128x128xf32> to vector<16x128xf32>
    %44 = vector.extract_strided_slice %39 {offsets = [0, 0], sizes = [16, 128], strides = [1, 1]} : vector<16x256xf32> to vector<16x128xf32>
    %45 = arith.addf %43, %44 : vector<16x128xf32>
    %46 = vector.broadcast %12 : vector<1x128xf32> to vector<16x128xf32>
    %47 = arith.addf %45, %46 : vector<16x128xf32>
    %48 = tpu.concatenate %47, %42 in 1 : vector<16x128xf32>, vector<16x128xf32> -> vector<16x256xf32>
    %49 = arith.negf %48 : vector<16x256xf32>
    %50 = math.exp %49 : vector<16x256xf32>
    %cst_23 = arith.constant 1.000000e+00 : f32
    %51 = vector.broadcast %cst_23 : f32 to vector<16x256xf32>
    %52 = arith.addf %51, %50 : vector<16x256xf32>
    %53 = arith.divf %51, %52 : vector<16x256xf32>
    %54 = math.tanh %48 : vector<16x256xf32>
    %55 = vector.extract_strided_slice %53 {offsets = [0, 0], sizes = [16, 128], strides = [1, 1]} : vector<16x256xf32> to vector<16x128xf32>
    %56 = vector.extract_strided_slice %54 {offsets = [0, 0], sizes = [16, 128], strides = [1, 1]} : vector<16x256xf32> to vector<16x128xf32>
    %57 = vector.extract_strided_slice %55 {offsets = [0, 32], sizes = [16, 32], strides = [1, 1]} : vector<16x128xf32> to vector<16x32xf32>
    %58 = arith.mulf %57, %33 : vector<16x32xf32>
    %59 = vector.extract_strided_slice %55 {offsets = [0, 0], sizes = [16, 32], strides = [1, 1]} : vector<16x128xf32> to vector<16x32xf32>
    %60 = vector.extract_strided_slice %56 {offsets = [0, 64], sizes = [16, 32], strides = [1, 1]} : vector<16x128xf32> to vector<16x32xf32>
    %61 = arith.mulf %59, %60 : vector<16x32xf32>
    %62 = arith.addf %58, %61 : vector<16x32xf32>
    %63 = vector.extract_strided_slice %55 {offsets = [0, 96], sizes = [16, 32], strides = [1, 1]} : vector<16x128xf32> to vector<16x32xf32>
    %64 = math.tanh %62 : vector<16x32xf32>
    %65 = arith.mulf %63, %64 : vector<16x32xf32>
    %66 = vector.extract_strided_slice %53 {offsets = [0, 128], sizes = [16, 128], strides = [1, 1]} : vector<16x256xf32> to vector<16x128xf32>
    %67 = vector.extract_strided_slice %54 {offsets = [0, 128], sizes = [16, 128], strides = [1, 1]} : vector<16x256xf32> to vector<16x128xf32>
    %68 = vector.extract_strided_slice %66 {offsets = [0, 32], sizes = [16, 32], strides = [1, 1]} : vector<16x128xf32> to vector<16x32xf32>
    %69 = arith.mulf %68, %7 : vector<16x32xf32>
    %70 = vector.extract_strided_slice %66 {offsets = [0, 0], sizes = [16, 32], strides = [1, 1]} : vector<16x128xf32> to vector<16x32xf32>
    %71 = vector.extract_strided_slice %67 {offsets = [0, 64], sizes = [16, 32], strides = [1, 1]} : vector<16x128xf32> to vector<16x32xf32>
    %72 = arith.mulf %70, %71 : vector<16x32xf32>
    %73 = arith.addf %69, %72 : vector<16x32xf32>
    %74 = vector.extract_strided_slice %66 {offsets = [0, 96], sizes = [16, 32], strides = [1, 1]} : vector<16x128xf32> to vector<16x32xf32>
    %75 = math.tanh %73 : vector<16x32xf32>
    %76 = arith.mulf %74, %75 : vector<16x32xf32>
    %77 = tpu.concatenate %65, %76 in 1 : vector<16x32xf32>, vector<16x32xf32> -> vector<16x64xf32>
    %78 = arith.truncf %77 : vector<16x64xf32> to vector<16x64xbf16>
    %cst_24 = arith.constant dense<0.000000e+00> : vector<16x256xf32>
    %79 = tpu.matmul %78, %11, %cst_24 {dimension_numbers = #tpu.dot_dimension_numbers<[1], [0], [0], [1], [0, 0, 1, 1], [], []>} : vector<16x64xbf16>, vector<64x256xbf16>, vector<16x256xf32> -> vector<16x256xf32>
    %80 = vector.extract_strided_slice %79 {offsets = [0, 128], sizes = [16, 128], strides = [1, 1]} : vector<16x256xf32> to vector<16x128xf32>
    %81 = vector.broadcast %13 : vector<1x128xf32> to vector<16x128xf32>
    %82 = arith.addf %80, %81 : vector<16x128xf32>
    %83 = vector.extract_strided_slice %10 {offsets = [32, 0], sizes = [16, 128], strides = [1, 1]} : vector<128x128xf32> to vector<16x128xf32>
    %84 = vector.extract_strided_slice %79 {offsets = [0, 0], sizes = [16, 128], strides = [1, 1]} : vector<16x256xf32> to vector<16x128xf32>
    %85 = arith.addf %83, %84 : vector<16x128xf32>
    %86 = vector.broadcast %12 : vector<1x128xf32> to vector<16x128xf32>
    %87 = arith.addf %85, %86 : vector<16x128xf32>
    %88 = tpu.concatenate %87, %82 in 1 : vector<16x128xf32>, vector<16x128xf32> -> vector<16x256xf32>
    %89 = arith.negf %88 : vector<16x256xf32>
    %90 = math.exp %89 : vector<16x256xf32>
    %cst_25 = arith.constant 1.000000e+00 : f32
    %91 = vector.broadcast %cst_25 : f32 to vector<16x256xf32>
    %92 = arith.addf %91, %90 : vector<16x256xf32>
    %93 = arith.divf %91, %92 : vector<16x256xf32>
    %94 = math.tanh %88 : vector<16x256xf32>
    %95 = vector.extract_strided_slice %93 {offsets = [0, 0], sizes = [16, 128], strides = [1, 1]} : vector<16x256xf32> to vector<16x128xf32>
    %96 = vector.extract_strided_slice %94 {offsets = [0, 0], sizes = [16, 128], strides = [1, 1]} : vector<16x256xf32> to vector<16x128xf32>
    %97 = vector.extract_strided_slice %95 {offsets = [0, 32], sizes = [16, 32], strides = [1, 1]} : vector<16x128xf32> to vector<16x32xf32>
    %98 = arith.mulf %97, %62 : vector<16x32xf32>
    %99 = vector.extract_strided_slice %95 {offsets = [0, 0], sizes = [16, 32], strides = [1, 1]} : vector<16x128xf32> to vector<16x32xf32>
    %100 = vector.extract_strided_slice %96 {offsets = [0, 64], sizes = [16, 32], strides = [1, 1]} : vector<16x128xf32> to vector<16x32xf32>
    %101 = arith.mulf %99, %100 : vector<16x32xf32>
    %102 = arith.addf %98, %101 : vector<16x32xf32>
    %103 = vector.extract_strided_slice %95 {offsets = [0, 96], sizes = [16, 32], strides = [1, 1]} : vector<16x128xf32> to vector<16x32xf32>
    %104 = math.tanh %102 : vector<16x32xf32>
    %105 = arith.mulf %103, %104 : vector<16x32xf32>
    %106 = vector.extract_strided_slice %93 {offsets = [0, 128], sizes = [16, 128], strides = [1, 1]} : vector<16x256xf32> to vector<16x128xf32>
    %107 = vector.extract_strided_slice %94 {offsets = [0, 128], sizes = [16, 128], strides = [1, 1]} : vector<16x256xf32> to vector<16x128xf32>
    %108 = vector.extract_strided_slice %106 {offsets = [0, 32], sizes = [16, 32], strides = [1, 1]} : vector<16x128xf32> to vector<16x32xf32>
    %109 = arith.mulf %108, %73 : vector<16x32xf32>
    %110 = vector.extract_strided_slice %106 {offsets = [0, 0], sizes = [16, 32], strides = [1, 1]} : vector<16x128xf32> to vector<16x32xf32>
    %111 = vector.extract_strided_slice %107 {offsets = [0, 64], sizes = [16, 32], strides = [1, 1]} : vector<16x128xf32> to vector<16x32xf32>
    %112 = arith.mulf %110, %111 : vector<16x32xf32>
    %113 = arith.addf %109, %112 : vector<16x32xf32>
    %114 = vector.extract_strided_slice %106 {offsets = [0, 96], sizes = [16, 32], strides = [1, 1]} : vector<16x128xf32> to vector<16x32xf32>
    %115 = math.tanh %113 : vector<16x32xf32>
    %116 = arith.mulf %114, %115 : vector<16x32xf32>
    %117 = tpu.concatenate %105, %116 in 1 : vector<16x32xf32>, vector<16x32xf32> -> vector<16x64xf32>
    %118 = arith.truncf %117 : vector<16x64xf32> to vector<16x64xbf16>
    %cst_26 = arith.constant dense<0.000000e+00> : vector<16x256xf32>
    %119 = tpu.matmul %118, %11, %cst_26 {dimension_numbers = #tpu.dot_dimension_numbers<[1], [0], [0], [1], [0, 0, 1, 1], [], []>} : vector<16x64xbf16>, vector<64x256xbf16>, vector<16x256xf32> -> vector<16x256xf32>
    %120 = vector.extract_strided_slice %119 {offsets = [0, 128], sizes = [16, 128], strides = [1, 1]} : vector<16x256xf32> to vector<16x128xf32>
    %121 = vector.broadcast %13 : vector<1x128xf32> to vector<16x128xf32>
    %122 = arith.addf %120, %121 : vector<16x128xf32>
    %123 = vector.extract_strided_slice %10 {offsets = [48, 0], sizes = [16, 128], strides = [1, 1]} : vector<128x128xf32> to vector<16x128xf32>
    %124 = vector.extract_strided_slice %119 {offsets = [0, 0], sizes = [16, 128], strides = [1, 1]} : vector<16x256xf32> to vector<16x128xf32>
    %125 = arith.addf %123, %124 : vector<16x128xf32>
    %126 = vector.broadcast %12 : vector<1x128xf32> to vector<16x128xf32>
    %127 = arith.addf %125, %126 : vector<16x128xf32>
    %128 = tpu.concatenate %127, %122 in 1 : vector<16x128xf32>, vector<16x128xf32> -> vector<16x256xf32>
    %129 = arith.negf %128 : vector<16x256xf32>
    %130 = math.exp %129 : vector<16x256xf32>
    %cst_27 = arith.constant 1.000000e+00 : f32
    %131 = vector.broadcast %cst_27 : f32 to vector<16x256xf32>
    %132 = arith.addf %131, %130 : vector<16x256xf32>
    %133 = arith.divf %131, %132 : vector<16x256xf32>
    %134 = math.tanh %128 : vector<16x256xf32>
    %135 = vector.extract_strided_slice %133 {offsets = [0, 0], sizes = [16, 128], strides = [1, 1]} : vector<16x256xf32> to vector<16x128xf32>
    %136 = vector.extract_strided_slice %134 {offsets = [0, 0], sizes = [16, 128], strides = [1, 1]} : vector<16x256xf32> to vector<16x128xf32>
    %137 = vector.extract_strided_slice %135 {offsets = [0, 32], sizes = [16, 32], strides = [1, 1]} : vector<16x128xf32> to vector<16x32xf32>
    %138 = arith.mulf %137, %102 : vector<16x32xf32>
    %139 = vector.extract_strided_slice %135 {offsets = [0, 0], sizes = [16, 32], strides = [1, 1]} : vector<16x128xf32> to vector<16x32xf32>
    %140 = vector.extract_strided_slice %136 {offsets = [0, 64], sizes = [16, 32], strides = [1, 1]} : vector<16x128xf32> to vector<16x32xf32>
    %141 = arith.mulf %139, %140 : vector<16x32xf32>
    %142 = arith.addf %138, %141 : vector<16x32xf32>
    %143 = vector.extract_strided_slice %135 {offsets = [0, 96], sizes = [16, 32], strides = [1, 1]} : vector<16x128xf32> to vector<16x32xf32>
    %144 = math.tanh %142 : vector<16x32xf32>
    %145 = arith.mulf %143, %144 : vector<16x32xf32>
    %146 = vector.extract_strided_slice %133 {offsets = [0, 128], sizes = [16, 128], strides = [1, 1]} : vector<16x256xf32> to vector<16x128xf32>
    %147 = vector.extract_strided_slice %134 {offsets = [0, 128], sizes = [16, 128], strides = [1, 1]} : vector<16x256xf32> to vector<16x128xf32>
    %148 = vector.extract_strided_slice %146 {offsets = [0, 32], sizes = [16, 32], strides = [1, 1]} : vector<16x128xf32> to vector<16x32xf32>
    %149 = arith.mulf %148, %113 : vector<16x32xf32>
    %150 = vector.extract_strided_slice %146 {offsets = [0, 0], sizes = [16, 32], strides = [1, 1]} : vector<16x128xf32> to vector<16x32xf32>
    %151 = vector.extract_strided_slice %147 {offsets = [0, 64], sizes = [16, 32], strides = [1, 1]} : vector<16x128xf32> to vector<16x32xf32>
    %152 = arith.mulf %150, %151 : vector<16x32xf32>
    %153 = arith.addf %149, %152 : vector<16x32xf32>
    %154 = vector.extract_strided_slice %146 {offsets = [0, 96], sizes = [16, 32], strides = [1, 1]} : vector<16x128xf32> to vector<16x32xf32>
    %155 = math.tanh %153 : vector<16x32xf32>
    %156 = arith.mulf %154, %155 : vector<16x32xf32>
    %157 = tpu.concatenate %145, %156 in 1 : vector<16x32xf32>, vector<16x32xf32> -> vector<16x64xf32>
    %158 = arith.truncf %157 : vector<16x64xf32> to vector<16x64xbf16>
    %cst_28 = arith.constant dense<0.000000e+00> : vector<16x256xf32>
    %159 = tpu.matmul %158, %11, %cst_28 {dimension_numbers = #tpu.dot_dimension_numbers<[1], [0], [0], [1], [0, 0, 1, 1], [], []>} : vector<16x64xbf16>, vector<64x256xbf16>, vector<16x256xf32> -> vector<16x256xf32>
    %160 = vector.extract_strided_slice %159 {offsets = [0, 128], sizes = [16, 128], strides = [1, 1]} : vector<16x256xf32> to vector<16x128xf32>
    %161 = vector.broadcast %13 : vector<1x128xf32> to vector<16x128xf32>
    %162 = arith.addf %160, %161 : vector<16x128xf32>
    %163 = vector.extract_strided_slice %10 {offsets = [64, 0], sizes = [16, 128], strides = [1, 1]} : vector<128x128xf32> to vector<16x128xf32>
    %164 = vector.extract_strided_slice %159 {offsets = [0, 0], sizes = [16, 128], strides = [1, 1]} : vector<16x256xf32> to vector<16x128xf32>
    %165 = arith.addf %163, %164 : vector<16x128xf32>
    %166 = vector.broadcast %12 : vector<1x128xf32> to vector<16x128xf32>
    %167 = arith.addf %165, %166 : vector<16x128xf32>
    %168 = tpu.concatenate %167, %162 in 1 : vector<16x128xf32>, vector<16x128xf32> -> vector<16x256xf32>
    %169 = arith.negf %168 : vector<16x256xf32>
    %170 = math.exp %169 : vector<16x256xf32>
    %cst_29 = arith.constant 1.000000e+00 : f32
    %171 = vector.broadcast %cst_29 : f32 to vector<16x256xf32>
    %172 = arith.addf %171, %170 : vector<16x256xf32>
    %173 = arith.divf %171, %172 : vector<16x256xf32>
    %174 = math.tanh %168 : vector<16x256xf32>
    %175 = vector.extract_strided_slice %173 {offsets = [0, 0], sizes = [16, 128], strides = [1, 1]} : vector<16x256xf32> to vector<16x128xf32>
    %176 = vector.extract_strided_slice %174 {offsets = [0, 0], sizes = [16, 128], strides = [1, 1]} : vector<16x256xf32> to vector<16x128xf32>
    %177 = vector.extract_strided_slice %175 {offsets = [0, 32], sizes = [16, 32], strides = [1, 1]} : vector<16x128xf32> to vector<16x32xf32>
    %178 = arith.mulf %177, %142 : vector<16x32xf32>
    %179 = vector.extract_strided_slice %175 {offsets = [0, 0], sizes = [16, 32], strides = [1, 1]} : vector<16x128xf32> to vector<16x32xf32>
    %180 = vector.extract_strided_slice %176 {offsets = [0, 64], sizes = [16, 32], strides = [1, 1]} : vector<16x128xf32> to vector<16x32xf32>
    %181 = arith.mulf %179, %180 : vector<16x32xf32>
    %182 = arith.addf %178, %181 : vector<16x32xf32>
    %183 = vector.extract_strided_slice %175 {offsets = [0, 96], sizes = [16, 32], strides = [1, 1]} : vector<16x128xf32> to vector<16x32xf32>
    %184 = math.tanh %182 : vector<16x32xf32>
    %185 = arith.mulf %183, %184 : vector<16x32xf32>
    %186 = vector.extract_strided_slice %173 {offsets = [0, 128], sizes = [16, 128], strides = [1, 1]} : vector<16x256xf32> to vector<16x128xf32>
    %187 = vector.extract_strided_slice %174 {offsets = [0, 128], sizes = [16, 128], strides = [1, 1]} : vector<16x256xf32> to vector<16x128xf32>
    %188 = vector.extract_strided_slice %186 {offsets = [0, 32], sizes = [16, 32], strides = [1, 1]} : vector<16x128xf32> to vector<16x32xf32>
    %189 = arith.mulf %188, %153 : vector<16x32xf32>
    %190 = vector.extract_strided_slice %186 {offsets = [0, 0], sizes = [16, 32], strides = [1, 1]} : vector<16x128xf32> to vector<16x32xf32>
    %191 = vector.extract_strided_slice %187 {offsets = [0, 64], sizes = [16, 32], strides = [1, 1]} : vector<16x128xf32> to vector<16x32xf32>
    %192 = arith.mulf %190, %191 : vector<16x32xf32>
    %193 = arith.addf %189, %192 : vector<16x32xf32>
    %194 = vector.extract_strided_slice %186 {offsets = [0, 96], sizes = [16, 32], strides = [1, 1]} : vector<16x128xf32> to vector<16x32xf32>
    %195 = math.tanh %193 : vector<16x32xf32>
    %196 = arith.mulf %194, %195 : vector<16x32xf32>
    %197 = tpu.concatenate %185, %196 in 1 : vector<16x32xf32>, vector<16x32xf32> -> vector<16x64xf32>
    %198 = arith.truncf %197 : vector<16x64xf32> to vector<16x64xbf16>
    %cst_30 = arith.constant dense<0.000000e+00> : vector<16x256xf32>
    %199 = tpu.matmul %198, %11, %cst_30 {dimension_numbers = #tpu.dot_dimension_numbers<[1], [0], [0], [1], [0, 0, 1, 1], [], []>} : vector<16x64xbf16>, vector<64x256xbf16>, vector<16x256xf32> -> vector<16x256xf32>
    %200 = vector.extract_strided_slice %199 {offsets = [0, 128], sizes = [16, 128], strides = [1, 1]} : vector<16x256xf32> to vector<16x128xf32>
    %201 = vector.broadcast %13 : vector<1x128xf32> to vector<16x128xf32>
    %202 = arith.addf %200, %201 : vector<16x128xf32>
    %203 = vector.extract_strided_slice %10 {offsets = [80, 0], sizes = [16, 128], strides = [1, 1]} : vector<128x128xf32> to vector<16x128xf32>
    %204 = vector.extract_strided_slice %199 {offsets = [0, 0], sizes = [16, 128], strides = [1, 1]} : vector<16x256xf32> to vector<16x128xf32>
    %205 = arith.addf %203, %204 : vector<16x128xf32>
    %206 = vector.broadcast %12 : vector<1x128xf32> to vector<16x128xf32>
    %207 = arith.addf %205, %206 : vector<16x128xf32>
    %208 = tpu.concatenate %207, %202 in 1 : vector<16x128xf32>, vector<16x128xf32> -> vector<16x256xf32>
    %209 = arith.negf %208 : vector<16x256xf32>
    %210 = math.exp %209 : vector<16x256xf32>
    %cst_31 = arith.constant 1.000000e+00 : f32
    %211 = vector.broadcast %cst_31 : f32 to vector<16x256xf32>
    %212 = arith.addf %211, %210 : vector<16x256xf32>
    %213 = arith.divf %211, %212 : vector<16x256xf32>
    %214 = math.tanh %208 : vector<16x256xf32>
    %215 = vector.extract_strided_slice %213 {offsets = [0, 0], sizes = [16, 128], strides = [1, 1]} : vector<16x256xf32> to vector<16x128xf32>
    %216 = vector.extract_strided_slice %214 {offsets = [0, 0], sizes = [16, 128], strides = [1, 1]} : vector<16x256xf32> to vector<16x128xf32>
    %217 = vector.extract_strided_slice %215 {offsets = [0, 32], sizes = [16, 32], strides = [1, 1]} : vector<16x128xf32> to vector<16x32xf32>
    %218 = arith.mulf %217, %182 : vector<16x32xf32>
    %219 = vector.extract_strided_slice %215 {offsets = [0, 0], sizes = [16, 32], strides = [1, 1]} : vector<16x128xf32> to vector<16x32xf32>
    %220 = vector.extract_strided_slice %216 {offsets = [0, 64], sizes = [16, 32], strides = [1, 1]} : vector<16x128xf32> to vector<16x32xf32>
    %221 = arith.mulf %219, %220 : vector<16x32xf32>
    %222 = arith.addf %218, %221 : vector<16x32xf32>
    %223 = vector.extract_strided_slice %215 {offsets = [0, 96], sizes = [16, 32], strides = [1, 1]} : vector<16x128xf32> to vector<16x32xf32>
    %224 = math.tanh %222 : vector<16x32xf32>
    %225 = arith.mulf %223, %224 : vector<16x32xf32>
    %226 = vector.extract_strided_slice %213 {offsets = [0, 128], sizes = [16, 128], strides = [1, 1]} : vector<16x256xf32> to vector<16x128xf32>
    %227 = vector.extract_strided_slice %214 {offsets = [0, 128], sizes = [16, 128], strides = [1, 1]} : vector<16x256xf32> to vector<16x128xf32>
    %228 = vector.extract_strided_slice %226 {offsets = [0, 32], sizes = [16, 32], strides = [1, 1]} : vector<16x128xf32> to vector<16x32xf32>
    %229 = arith.mulf %228, %193 : vector<16x32xf32>
    %230 = vector.extract_strided_slice %226 {offsets = [0, 0], sizes = [16, 32], strides = [1, 1]} : vector<16x128xf32> to vector<16x32xf32>
    %231 = vector.extract_strided_slice %227 {offsets = [0, 64], sizes = [16, 32], strides = [1, 1]} : vector<16x128xf32> to vector<16x32xf32>
    %232 = arith.mulf %230, %231 : vector<16x32xf32>
    %233 = arith.addf %229, %232 : vector<16x32xf32>
    %234 = vector.extract_strided_slice %226 {offsets = [0, 96], sizes = [16, 32], strides = [1, 1]} : vector<16x128xf32> to vector<16x32xf32>
    %235 = math.tanh %233 : vector<16x32xf32>
    %236 = arith.mulf %234, %235 : vector<16x32xf32>
    %237 = tpu.concatenate %225, %236 in 1 : vector<16x32xf32>, vector<16x32xf32> -> vector<16x64xf32>
    %238 = arith.truncf %237 : vector<16x64xf32> to vector<16x64xbf16>
    %cst_32 = arith.constant dense<0.000000e+00> : vector<16x256xf32>
    %239 = tpu.matmul %238, %11, %cst_32 {dimension_numbers = #tpu.dot_dimension_numbers<[1], [0], [0], [1], [0, 0, 1, 1], [], []>} : vector<16x64xbf16>, vector<64x256xbf16>, vector<16x256xf32> -> vector<16x256xf32>
    %240 = vector.extract_strided_slice %239 {offsets = [0, 128], sizes = [16, 128], strides = [1, 1]} : vector<16x256xf32> to vector<16x128xf32>
    %241 = vector.broadcast %13 : vector<1x128xf32> to vector<16x128xf32>
    %242 = arith.addf %240, %241 : vector<16x128xf32>
    %243 = vector.extract_strided_slice %10 {offsets = [96, 0], sizes = [16, 128], strides = [1, 1]} : vector<128x128xf32> to vector<16x128xf32>
    %244 = vector.extract_strided_slice %239 {offsets = [0, 0], sizes = [16, 128], strides = [1, 1]} : vector<16x256xf32> to vector<16x128xf32>
    %245 = arith.addf %243, %244 : vector<16x128xf32>
    %246 = vector.broadcast %12 : vector<1x128xf32> to vector<16x128xf32>
    %247 = arith.addf %245, %246 : vector<16x128xf32>
    %248 = tpu.concatenate %247, %242 in 1 : vector<16x128xf32>, vector<16x128xf32> -> vector<16x256xf32>
    %249 = arith.negf %248 : vector<16x256xf32>
    %250 = math.exp %249 : vector<16x256xf32>
    %cst_33 = arith.constant 1.000000e+00 : f32
    %251 = vector.broadcast %cst_33 : f32 to vector<16x256xf32>
    %252 = arith.addf %251, %250 : vector<16x256xf32>
    %253 = arith.divf %251, %252 : vector<16x256xf32>
    %254 = math.tanh %248 : vector<16x256xf32>
    %255 = vector.extract_strided_slice %253 {offsets = [0, 0], sizes = [16, 128], strides = [1, 1]} : vector<16x256xf32> to vector<16x128xf32>
    %256 = vector.extract_strided_slice %254 {offsets = [0, 0], sizes = [16, 128], strides = [1, 1]} : vector<16x256xf32> to vector<16x128xf32>
    %257 = vector.extract_strided_slice %255 {offsets = [0, 32], sizes = [16, 32], strides = [1, 1]} : vector<16x128xf32> to vector<16x32xf32>
    %258 = arith.mulf %257, %222 : vector<16x32xf32>
    %259 = vector.extract_strided_slice %255 {offsets = [0, 0], sizes = [16, 32], strides = [1, 1]} : vector<16x128xf32> to vector<16x32xf32>
    %260 = vector.extract_strided_slice %256 {offsets = [0, 64], sizes = [16, 32], strides = [1, 1]} : vector<16x128xf32> to vector<16x32xf32>
    %261 = arith.mulf %259, %260 : vector<16x32xf32>
    %262 = arith.addf %258, %261 : vector<16x32xf32>
    %263 = vector.extract_strided_slice %255 {offsets = [0, 96], sizes = [16, 32], strides = [1, 1]} : vector<16x128xf32> to vector<16x32xf32>
    %264 = math.tanh %262 : vector<16x32xf32>
    %265 = arith.mulf %263, %264 : vector<16x32xf32>
    %266 = vector.extract_strided_slice %253 {offsets = [0, 128], sizes = [16, 128], strides = [1, 1]} : vector<16x256xf32> to vector<16x128xf32>
    %267 = vector.extract_strided_slice %254 {offsets = [0, 128], sizes = [16, 128], strides = [1, 1]} : vector<16x256xf32> to vector<16x128xf32>
    %268 = vector.extract_strided_slice %266 {offsets = [0, 32], sizes = [16, 32], strides = [1, 1]} : vector<16x128xf32> to vector<16x32xf32>
    %269 = arith.mulf %268, %233 : vector<16x32xf32>
    %270 = vector.extract_strided_slice %266 {offsets = [0, 0], sizes = [16, 32], strides = [1, 1]} : vector<16x128xf32> to vector<16x32xf32>
    %271 = vector.extract_strided_slice %267 {offsets = [0, 64], sizes = [16, 32], strides = [1, 1]} : vector<16x128xf32> to vector<16x32xf32>
    %272 = arith.mulf %270, %271 : vector<16x32xf32>
    %273 = arith.addf %269, %272 : vector<16x32xf32>
    %274 = vector.extract_strided_slice %266 {offsets = [0, 96], sizes = [16, 32], strides = [1, 1]} : vector<16x128xf32> to vector<16x32xf32>
    %275 = math.tanh %273 : vector<16x32xf32>
    %276 = arith.mulf %274, %275 : vector<16x32xf32>
    %277 = tpu.concatenate %265, %276 in 1 : vector<16x32xf32>, vector<16x32xf32> -> vector<16x64xf32>
    %278 = arith.truncf %277 : vector<16x64xf32> to vector<16x64xbf16>
    %cst_34 = arith.constant dense<0.000000e+00> : vector<16x256xf32>
    %279 = tpu.matmul %278, %11, %cst_34 {dimension_numbers = #tpu.dot_dimension_numbers<[1], [0], [0], [1], [0, 0, 1, 1], [], []>} : vector<16x64xbf16>, vector<64x256xbf16>, vector<16x256xf32> -> vector<16x256xf32>
    %280 = vector.extract_strided_slice %279 {offsets = [0, 128], sizes = [16, 128], strides = [1, 1]} : vector<16x256xf32> to vector<16x128xf32>
    %281 = vector.broadcast %13 : vector<1x128xf32> to vector<16x128xf32>
    %282 = arith.addf %280, %281 : vector<16x128xf32>
    %283 = vector.extract_strided_slice %10 {offsets = [112, 0], sizes = [16, 128], strides = [1, 1]} : vector<128x128xf32> to vector<16x128xf32>
    %284 = vector.extract_strided_slice %279 {offsets = [0, 0], sizes = [16, 128], strides = [1, 1]} : vector<16x256xf32> to vector<16x128xf32>
    %285 = arith.addf %283, %284 : vector<16x128xf32>
    %286 = vector.broadcast %12 : vector<1x128xf32> to vector<16x128xf32>
    %287 = arith.addf %285, %286 : vector<16x128xf32>
    %288 = tpu.concatenate %287, %282 in 1 : vector<16x128xf32>, vector<16x128xf32> -> vector<16x256xf32>
    %289 = arith.negf %288 : vector<16x256xf32>
    %290 = math.exp %289 : vector<16x256xf32>
    %cst_35 = arith.constant 1.000000e+00 : f32
    %291 = vector.broadcast %cst_35 : f32 to vector<16x256xf32>
    %292 = arith.addf %291, %290 : vector<16x256xf32>
    %293 = arith.divf %291, %292 : vector<16x256xf32>
    %294 = math.tanh %288 : vector<16x256xf32>
    %295 = vector.extract_strided_slice %293 {offsets = [0, 0], sizes = [16, 128], strides = [1, 1]} : vector<16x256xf32> to vector<16x128xf32>
    %296 = vector.extract_strided_slice %294 {offsets = [0, 0], sizes = [16, 128], strides = [1, 1]} : vector<16x256xf32> to vector<16x128xf32>
    %297 = vector.extract_strided_slice %295 {offsets = [0, 32], sizes = [16, 32], strides = [1, 1]} : vector<16x128xf32> to vector<16x32xf32>
    %298 = arith.mulf %297, %262 : vector<16x32xf32>
    %299 = vector.extract_strided_slice %295 {offsets = [0, 0], sizes = [16, 32], strides = [1, 1]} : vector<16x128xf32> to vector<16x32xf32>
    %300 = vector.extract_strided_slice %296 {offsets = [0, 64], sizes = [16, 32], strides = [1, 1]} : vector<16x128xf32> to vector<16x32xf32>
    %301 = arith.mulf %299, %300 : vector<16x32xf32>
    %302 = arith.addf %298, %301 : vector<16x32xf32>
    %303 = vector.extract_strided_slice %295 {offsets = [0, 96], sizes = [16, 32], strides = [1, 1]} : vector<16x128xf32> to vector<16x32xf32>
    %304 = math.tanh %302 : vector<16x32xf32>
    %305 = arith.mulf %303, %304 : vector<16x32xf32>
    %306 = vector.extract_strided_slice %293 {offsets = [0, 128], sizes = [16, 128], strides = [1, 1]} : vector<16x256xf32> to vector<16x128xf32>
    %307 = vector.extract_strided_slice %294 {offsets = [0, 128], sizes = [16, 128], strides = [1, 1]} : vector<16x256xf32> to vector<16x128xf32>
    %308 = vector.extract_strided_slice %306 {offsets = [0, 32], sizes = [16, 32], strides = [1, 1]} : vector<16x128xf32> to vector<16x32xf32>
    %309 = arith.mulf %308, %273 : vector<16x32xf32>
    %310 = vector.extract_strided_slice %306 {offsets = [0, 0], sizes = [16, 32], strides = [1, 1]} : vector<16x128xf32> to vector<16x32xf32>
    %311 = vector.extract_strided_slice %307 {offsets = [0, 64], sizes = [16, 32], strides = [1, 1]} : vector<16x128xf32> to vector<16x32xf32>
    %312 = arith.mulf %310, %311 : vector<16x32xf32>
    %313 = arith.addf %309, %312 : vector<16x32xf32>
    %314 = vector.extract_strided_slice %306 {offsets = [0, 96], sizes = [16, 32], strides = [1, 1]} : vector<16x128xf32> to vector<16x32xf32>
    %315 = math.tanh %313 : vector<16x32xf32>
    %316 = arith.mulf %314, %315 : vector<16x32xf32>
    %317 = tpu.concatenate %305, %316 in 1 : vector<16x32xf32>, vector<16x32xf32> -> vector<16x64xf32>
    %318 = arith.truncf %317 : vector<16x64xf32> to vector<16x64xbf16>
    %cst_36 = arith.constant dense<0.000000e+00> : vector<16x256xf32>
    %319 = tpu.matmul %318, %11, %cst_36 {dimension_numbers = #tpu.dot_dimension_numbers<[1], [0], [0], [1], [0, 0, 1, 1], [], []>} : vector<16x64xbf16>, vector<64x256xbf16>, vector<16x256xf32> -> vector<16x256xf32>
    %320 = vector.extract_strided_slice %319 {offsets = [0, 128], sizes = [16, 128], strides = [1, 1]} : vector<16x256xf32> to vector<16x128xf32>
    %321 = vector.broadcast %13 : vector<1x128xf32> to vector<16x128xf32>
    %322 = arith.addf %320, %321 : vector<16x128xf32>
    %323 = arith.negf %322 : vector<16x128xf32>
    %324 = math.exp %323 : vector<16x128xf32>
    %cst_37 = arith.constant 1.000000e+00 : f32
    %325 = vector.broadcast %cst_37 : f32 to vector<16x128xf32>
    %326 = arith.addf %325, %324 : vector<16x128xf32>
    %327 = arith.divf %325, %326 : vector<16x128xf32>
    %328 = math.tanh %322 : vector<16x128xf32>
    %329 = vector.extract_strided_slice %327 {offsets = [0, 32], sizes = [16, 32], strides = [1, 1]} : vector<16x128xf32> to vector<16x32xf32>
    %330 = arith.mulf %329, %313 : vector<16x32xf32>
    %331 = vector.extract_strided_slice %327 {offsets = [0, 0], sizes = [16, 32], strides = [1, 1]} : vector<16x128xf32> to vector<16x32xf32>
    %332 = vector.extract_strided_slice %328 {offsets = [0, 64], sizes = [16, 32], strides = [1, 1]} : vector<16x128xf32> to vector<16x32xf32>
    %333 = arith.mulf %331, %332 : vector<16x32xf32>
    %334 = arith.addf %330, %333 : vector<16x32xf32>
    %335 = vector.extract_strided_slice %327 {offsets = [0, 96], sizes = [16, 32], strides = [1, 1]} : vector<16x128xf32> to vector<16x32xf32>
    %336 = math.tanh %334 : vector<16x32xf32>
    %337 = arith.mulf %335, %336 : vector<16x32xf32>
    %c0_38 = arith.constant 0 : index
    %c0_39 = arith.constant 0 : index
    %c0_40 = arith.constant 0 : index
    %338 = vector.load %arg11[%c0_38, %c0_39, %c0_40] : memref<2x16x32xf32, #tpu.memory_space<vmem>>, vector<1x16x32xf32>
    %339 = vector.shape_cast %338 : vector<1x16x32xf32> to vector<16x32xf32>
    %340 = vector.shape_cast %305 : vector<16x32xf32> to vector<1x16x32xf32>
    tpu.vector_store %arg11[%c0_38, %c0_39, %c0_40], %340 {strides = array<i32>} : memref<2x16x32xf32, #tpu.memory_space<vmem>>, vector<1x16x32xf32>,
    %c1_41 = arith.constant 1 : index
    %c0_42 = arith.constant 0 : index
    %c0_43 = arith.constant 0 : index
    %341 = vector.load %arg11[%c1_41, %c0_42, %c0_43] : memref<2x16x32xf32, #tpu.memory_space<vmem>>, vector<1x16x32xf32>
    %342 = vector.shape_cast %341 : vector<1x16x32xf32> to vector<16x32xf32>
    %343 = vector.shape_cast %337 : vector<16x32xf32> to vector<1x16x32xf32>
    tpu.vector_store %arg11[%c1_41, %c0_42, %c0_43], %343 {strides = array<i32>} : memref<2x16x32xf32, #tpu.memory_space<vmem>>, vector<1x16x32xf32>,
    %c0_44 = arith.constant 0 : index
    %c0_45 = arith.constant 0 : index
    %c0_46 = arith.constant 0 : index
    %344 = vector.load %arg12[%c0_44, %c0_45, %c0_46] : memref<2x16x32xf32, #tpu.memory_space<vmem>>, vector<1x16x32xf32>
    %345 = vector.shape_cast %344 : vector<1x16x32xf32> to vector<16x32xf32>
    %346 = vector.shape_cast %302 : vector<16x32xf32> to vector<1x16x32xf32>
    tpu.vector_store %arg12[%c0_44, %c0_45, %c0_46], %346 {strides = array<i32>} : memref<2x16x32xf32, #tpu.memory_space<vmem>>, vector<1x16x32xf32>,
    %c1_47 = arith.constant 1 : index
    %c0_48 = arith.constant 0 : index
    %c0_49 = arith.constant 0 : index
    %347 = vector.load %arg12[%c1_47, %c0_48, %c0_49] : memref<2x16x32xf32, #tpu.memory_space<vmem>>, vector<1x16x32xf32>
    %348 = vector.shape_cast %347 : vector<1x16x32xf32> to vector<16x32xf32>
    %349 = vector.shape_cast %334 : vector<16x32xf32> to vector<1x16x32xf32>
    tpu.vector_store %arg12[%c1_47, %c0_48, %c0_49], %349 {strides = array<i32>} : memref<2x16x32xf32, #tpu.memory_space<vmem>>, vector<1x16x32xf32>,
    %c0_50 = arith.constant 0 : index
    %c0_51 = arith.constant 0 : index
    %350 = vector.load %arg8[%c0_50, %c0_51] : memref<1x32xf32, #tpu.memory_space<vmem>>, vector<1x32xf32>
    %351 = vector.broadcast %350 : vector<1x32xf32> to vector<16x32xf32>
    %352 = arith.mulf %337, %351 : vector<16x32xf32>
    %cst_52 = arith.constant dense<0.000000e+00> : vector<16xf32>
    %353 = vector.multi_reduction <add>, %352, %cst_52 [1] : vector<16x32xf32> to vector<16xf32>
    %354 = vector.shape_cast %353 : vector<16xf32> to vector<16x1xf32>
    %c0_53 = arith.constant 0 : index
    %c0_54 = arith.constant 0 : index
    %355 = vector.load %arg9[%c0_53, %c0_54] : memref<1x1xf32, #tpu.memory_space<vmem>>, vector<1x1xf32>
    %356 = vector.broadcast %355 : vector<1x1xf32> to vector<16x1xf32>
    %357 = arith.addf %354, %356 : vector<16x1xf32>
    %358 = arith.negf %357 : vector<16x1xf32>
    %359 = math.exp %358 : vector<16x1xf32>
    %cst_55 = arith.constant 1.000000e+00 : f32
    %360 = vector.broadcast %cst_55 : f32 to vector<16x1xf32>
    %361 = arith.addf %360, %359 : vector<16x1xf32>
    %362 = arith.divf %360, %361 : vector<16x1xf32>
    %c0_56 = arith.constant 0 : index
    %c0_57 = arith.constant 0 : index
    %363 = vector.load %arg10[%c0_56, %c0_57] : memref<16x1xf32, #tpu.memory_space<vmem>>, vector<16x1xf32>
    tpu.vector_store %arg10[%c0_56, %c0_57], %362 {strides = array<i32>} : memref<16x1xf32, #tpu.memory_space<vmem>>, vector<16x1xf32>,
    return
  }
  func.func @transform_0(%arg0: i32) -> (i32, i32) {
    %c0_i32 = arith.constant 0 : i32
    %c0_i32_0 = arith.constant 0 : i32
    return %arg0, %c0_i32 : i32, i32
  }
  func.func @transform_1(%arg0: i32) -> (i32, i32) {
    %c0_i32 = arith.constant 0 : i32
    %c0_i32_0 = arith.constant 0 : i32
    %c0_i32_1 = arith.constant 0 : i32
    return %c0_i32, %c0_i32_0 : i32, i32
  }
  func.func @transform_2(%arg0: i32) -> (i32, i32) {
    %c0_i32 = arith.constant 0 : i32
    %c0_i32_0 = arith.constant 0 : i32
    %c0_i32_1 = arith.constant 0 : i32
    return %c0_i32, %c0_i32_0 : i32, i32
  }
  func.func @transform_3(%arg0: i32) -> (i32, i32) {
    %c0_i32 = arith.constant 0 : i32
    %c0_i32_0 = arith.constant 0 : i32
    %c0_i32_1 = arith.constant 0 : i32
    return %c0_i32, %c0_i32_0 : i32, i32
  }
  func.func @transform_4(%arg0: i32) -> (i32, i32) {
    %c0_i32 = arith.constant 0 : i32
    %c0_i32_0 = arith.constant 0 : i32
    %c0_i32_1 = arith.constant 0 : i32
    return %c0_i32, %c0_i32_0 : i32, i32
  }
  func.func @transform_5(%arg0: i32) -> (i32, i32, i32) {
    %c0_i32 = arith.constant 0 : i32
    %c0_i32_0 = arith.constant 0 : i32
    %c0_i32_1 = arith.constant 0 : i32
    %c0_i32_2 = arith.constant 0 : i32
    return %c0_i32, %c0_i32_0, %c0_i32_1 : i32, i32, i32
  }
  func.func @transform_6(%arg0: i32) -> (i32, i32, i32) {
    %c0_i32 = arith.constant 0 : i32
    %c0_i32_0 = arith.constant 0 : i32
    %c0_i32_1 = arith.constant 0 : i32
    %c0_i32_2 = arith.constant 0 : i32
    return %c0_i32, %c0_i32_0, %c0_i32_1 : i32, i32, i32
  }
  func.func @transform_7(%arg0: i32) -> (i32, i32) {
    %c0_i32 = arith.constant 0 : i32
    %c0_i32_0 = arith.constant 0 : i32
    %c0_i32_1 = arith.constant 0 : i32
    return %c0_i32, %c0_i32_0 : i32, i32
  }
  func.func @transform_8(%arg0: i32) -> (i32, i32) {
    %c0_i32 = arith.constant 0 : i32
    %c0_i32_0 = arith.constant 0 : i32
    %c0_i32_1 = arith.constant 0 : i32
    return %c0_i32, %c0_i32_0 : i32, i32
  }
  func.func @transform_9(%arg0: i32) -> (i32, i32) {
    %c0_i32 = arith.constant 0 : i32
    %c0_i32_0 = arith.constant 0 : i32
    %c0_i32_1 = arith.constant 0 : i32
    return %c0_i32, %c0_i32_0 : i32, i32
  }
  func.func @transform_10(%arg0: i32) -> (i32, i32, i32) {
    %c0_i32 = arith.constant 0 : i32
    %c0_i32_0 = arith.constant 0 : i32
    %c0_i32_1 = arith.constant 0 : i32
    %c0_i32_2 = arith.constant 0 : i32
    return %c0_i32, %c0_i32_0, %c0_i32_1 : i32, i32, i32
  }
  func.func @transform_11(%arg0: i32) -> (i32, i32, i32) {
    %c0_i32 = arith.constant 0 : i32
    %c0_i32_0 = arith.constant 0 : i32
    %c0_i32_1 = arith.constant 0 : i32
    %c0_i32_2 = arith.constant 0 : i32
    return %c0_i32, %c0_i32_0, %c0_i32_1 : i32, i32, i32
  }
}

</mosaic_0001>

<bundles_post_ra>
// kernel: sentiment_rnn_forward.1
= control target key start
LH: loop header
LB: loop body
LE: loop exit
PB: predicated region body
PF: predicated region fallthrough
CT: control target
= control target key end

     0   :  { %v2309_v2 = vmov 0   ;;  %s2310_s25 = smov 32   ;;  %vm136_vm0 = vcmask 523264   ;;  %vm276_vm1 = vcmask 261120   ;;  %s2311_s17 = smov 64   ;;  %vm1798_vm2 = vcmask 7168   ;;  %s3013_s5 = inlined_call_operand.vmem [shape: f32[2,16,32], index: 5, kind: input, shape index: {}]   ;;  %s3014_s1 = inlined_call_operand.vmem [shape: bf16[64,128], index: 1, kind: input, shape index: {}]   ;;  %s3015_s2 = inlined_call_operand.vmem [shape: bf16[64,256], index: 2, kind: input, shape index: {}]   ;;  %s3016_s0 = inlined_call_operand.vmem [shape: bf16[128,64], index: 0, kind: input, shape index: {}]   ;;  %s3017_s3 = inlined_call_operand.vmem [shape: f32[1,128], index: 3, kind: input, shape index: {}]   ;;  %s3018_s6 = inlined_call_operand.vmem [shape: f32[2,16,32], index: 6, kind: input, shape index: {}]   ;;  %s3019_s4 = inlined_call_operand.vmem [shape: f32[1,128], index: 4, kind: input, shape index: {}]   ;;  %s3020_s10 = inlined_call_operand.vmem [shape: f32[2,16,32], index: 10, kind: output, shape index: {1}]   ;;  %s3021_s7 = inlined_call_operand.vmem [shape: f32[1,32], index: 7, kind: input, shape index: {}]   ;;  %s3022_s8 = inlined_call_operand.<no memory space> [shape: f32[1,1], index: 8, kind: input, shape index: {}]   ;;  %s3023_s11 = inlined_call_operand.vmem [shape: f32[2,16,32], index: 11, kind: output, shape index: {2}]   ;;  %s3024_s9 = inlined_call_operand.vmem [shape: f32[16,1], index: 9, kind: output, shape index: {0}]  }
   0x1   :  { %v1813_v0 = vld [vmem:[%s3013_s5 + $0x10] sm:$0xff]  ;;  %v1814_v1 = vld [vmem:[%s3013_s5 + $0x18] sm:$0xff]  ;;  %355 = vmatprep.mubr.bf16.mxu1 %v2309_v2  ;;  %v2011_v4 = vld [vmem:[%s3014_s1] sm:$0xff]   ;;  %s2312_s21 = smov 96  }
   0x2   :  { %v1936_v3 = vpack.i.bf16 %v1814_v1, %v1813_v0  ;;  %v2012_v5 = vld [vmem:[%s3014_s1 + $0x8] sm:$0xff]   ;;  %1908 = vmatprep.subr.bf16.mxu0 %v2011_v4  ;;  %v2016_v8 = vld [vmem:[%s3014_s1 + $0x10] sm:$0xff]   ;;  %v2020_v11 = vld [vmem:[%s3014_s1 + $0x18] sm:$0xff]  }
   0x3   :  { %v2390_v6 = vld [vmem:[%s3015_s2 + $0x4] ss:$8 sps:$4 sm:$0xff]   ;;  %v2395_v7 = vld [vmem:[%s3015_s2] ss:$8 sps:$4 sm:$0xff]   ;;  %1909 = vmatpush3.bf16.msra.mxu0 %v2011_v4  ;;  %v2404_v9 = vld [vmem:[%s3015_s2 + $0x14] ss:$8 sps:$4 sm:$0xff]  }
   0x4   :  { %1937 = vrot.lane.b32.xlu0 %v1936_v3, %s2310_s25  ;;  %1910 = vmatprep.subr.bf16.mxu0 %v2012_v5  ;;  %v2410_v10 = vld [vmem:[%s3015_s2 + $0x10] ss:$8 sps:$4 sm:$0xff]   ;;  %v2419_v12 = vld [vmem:[%s3015_s2 + $0x24] ss:$8 sps:$4 sm:$0xff]   ;;  %v2424_v13 = vld [vmem:[%s3015_s2 + $0x20] ss:$8 sps:$4 sm:$0xff]  }
   0x5   :  { %323 = vmatprep.subr.bf16.mxu1 %v2390_v6  ;;  %v2024_v14 = vld [vmem:[%s3016_s0] sm:$0xff]   ;;  %v2435_v15 = vld [vmem:[%s3015_s2 + $0x34] ss:$8 sps:$4 sm:$0xff]   ;;  %v2440_v16 = vld [vmem:[%s3015_s2 + $0x30] ss:$8 sps:$4 sm:$0xff]  }
   0x6   :  { %324 = vmatpush1.bf16.msra.mxu1 %v2395_v7  ;;  %1916 = vmatprep.mubr.msk.bf16.mxu0 %vm136_vm0, %v2024_v14  ;;  %v2025_v17 = vld [vmem:[%s3016_s0 + $0x8] sm:$0xff]   ;;  %v38_v19 = vld [vmem:[%s3013_s5] sm:$0xff] }
   0x7   :  { %325 = vmatprep.subr.bf16.mxu1 %v2404_v9  ;;  %1911 = vmatpush3.bf16.msra.mxu0 %v2012_v5  ;;  %v39_v20 = vld [vmem:[%s3013_s5 + $0x8] sm:$0xff]  ;;  %v2492_v30 = vld [vmem:[%s3017_s3] ss:$0 sm:$0xff] }
   0x8   :  { %1912 = vmatprep.subr.bf16.mxu0 %v2016_v8  ;;  %v44_v40 = vld [vmem:[%s3018_s6 + $0x8] sm:$0xff]  ;;  %v43_v42 = vld [vmem:[%s3018_s6] sm:$0xff] }
   0xa   :  { %326 = vmatpush1.bf16.msra.mxu1 %v2410_v10 }
   0xb   :  { %327 = vmatprep.subr.bf16.mxu1 %v2419_v12  ;;  %1913 = vmatpush3.bf16.msra.mxu0 %v2016_v8 }
   0xc   :  { %1914 = vmatprep.subr.bf16.mxu0 %v2020_v11 }
   0xe   :  { %328 = vmatpush1.bf16.msra.mxu1 %v2424_v13 }
   0xf   :  { %329 = vmatprep.subr.bf16.mxu1 %v2435_v15  ;;  %1915 = vmatpush3.bf16.msra.mxu0 %v2020_v11 }
  0x10   :  { %625 = vmatprep.subr.bf16.mxu0 %v2390_v6 }
  0x12   :  { %330 = vmatpush1.bf16.msra.mxu1 %v2440_v16  ;;  %1917 = vmatmul.mubr.msk.bf16.vlgmr.msra.gmra.mrb[0].mxu0 %vm136_vm0, %v2025_v17 }
  0x13   :  { %444 = vmatprep.subr.bf16.mxu1 %v2390_v6  ;;  %626 = vmatpush1.bf16.msra.mxu0 %v2395_v7 }
  0x14   :  { %627 = vmatprep.subr.bf16.mxu0 %v2404_v9 }
  0x17   :  { %628 = vmatpush1.bf16.msra.mxu0 %v2410_v10 }
  0x18   :  { %629 = vmatprep.subr.bf16.mxu0 %v2419_v12 }
  0x1b   :  { %630 = vmatpush1.bf16.msra.mxu0 %v2424_v13 }
  0x1c   :  { %631 = vmatprep.subr.bf16.mxu0 %v2435_v15 }
  0x1f   :  { %632 = vmatpush1.bf16.msra.mxu0 %v2440_v16 }
  0x20   :  { %959 = vmatprep.subr.bf16.mxu0 %v2390_v6 }
  0x76   :  { %v2459_v18 = vpop.permute.xlu0 %1937 }
  0x77   :  { %v1940_v21 = vunpack.i.h.bf16 %v2459_v18  ;;  %v1939_v22 = vunpack.i.l.bf16 %v2459_v18 }
  0x79   :  { %v277_v23 = vsel %vm276_vm1, %v38_v19, %v1939_v22  ;;  %v278_v24 = vsel %vm276_vm1, %v39_v20, %v1940_v21 }
  0x7a   :  { %v279_v25 = vpack.c.bf16 %v278_v24, %v277_v23  ;;  %v2537_v24 = vld [vmem:[%s3019_s4] ss:$0 sm:$0xff] }
  0x7c   :  { %1845 = vmatmul.mubr.msk.bf16.vlgmr.msra.gmra.mrb[0].mxu1 %vm136_vm0, %v279_v25 }
  0x7d   :  { %445 = vmatpush1.bf16.msra.mxu1 %v2395_v7  ;;  %476 = vmatprep.mubr.bf16.mxu1 %v2309_v2 }
  0x7e   :  { %446 = vmatprep.subr.bf16.mxu1 %v2404_v9 }
  0x81   :  { %447 = vmatpush1.bf16.msra.mxu1 %v2410_v10 }
  0x82   :  { %448 = vmatprep.subr.bf16.mxu1 %v2419_v12 }
  0x85   :  { %449 = vmatpush1.bf16.msra.mxu1 %v2424_v13 }
  0x86   :  { %450 = vmatprep.subr.bf16.mxu1 %v2435_v15 }
  0x89   :  { %451 = vmatpush1.bf16.msra.mxu1 %v2440_v16 }
  0x8a   :  { %792 = vmatprep.subr.bf16.mxu1 %v2390_v6 }
  0xe5   :  { %v2485_v26 = vpop.f32.mrb[0].mxu0 }
  0xe6   :  { %v195_v27 = vpop.f32.mrb[1].mxu0 }
  0xe7   :  { %v2487_v28 = vpop.f32.mrb[2].mxu0 }
  0xe8   :  { %v198_v29 = vpop.f32.mrb[3].mxu0 }
 0x14f   :  { %v357_v31 = vpop.f32.mrb[0].mxu1 }
 0x150   :  { %v364_v32 = vadd.f32 %v357_v31, %v195_v27  ;;  %v359_v33 = vpop.f32.mrb[1].mxu1 }
 0x151   :  { %v360_v34 = vpop.f32.mrb[2].mxu1 }
 0x152   :  { %v372_v35 = vadd.f32 %v2492_v30, %v364_v32  ;;  %v365_v36 = vadd.f32 %v360_v34, %v198_v29  ;;  %v362_v37 = vpop.f32.mrb[3].mxu1 }
 0x154   :  { %2035 = vtanh.f32 %v372_v35  ;;  %v373_v38 = vadd.f32 %v2492_v30, %v365_v36  ;;  %v1847_v43 = vmul.f32 -1.442695, %v372_v35 }
 0x156   :  { %2037 = vtanh.f32 %v373_v38  ;;  %v1848_v44 = vmul.f32 -1.442695, %v373_v38  ;;  %v1816_v38 = vld [vmem:[%s3018_s6 + $0x18] sm:$0xff] }
 0x157   :  { %2039 = vpow2.f32 %v1847_v43 }
 0x158   :  { %2041 = vpow2.f32 %v1848_v44 }
 0x15e   :  { %v2036_v39 = vpop.eup %2035 }
 0x15f   :  { %400 = vrot.lane.b32.xlu0 %v2036_v39, %s2311_s17 }
 0x160   :  { %v2038_v41 = vpop.eup %2037 }
 0x161   :  { %402 = vrot.lane.b32.xlu1 %v2038_v41, %s2311_s17  ;;  %v2040_v45 = vpop.eup %2039 }
 0x162   :  { %v2042_v46 = vpop.eup %2041  ;;  %v380_v47 = vadd.f32 1.0, %v2040_v45 }
 0x163   :  { %392 = vrot.lane.b32.xlu0 %v44_v40, %s2310_s25  ;;  %v381_v48 = vadd.f32 1.0, %v2042_v46 }
 0x164   :  { %2043 = vrcp.f32 %v380_v47 }
 0x165   :  { %390 = vrot.lane.b32.xlu1 %v43_v42, %s2310_s25  ;;  %2045 = vrcp.f32 %v381_v48 }
 0x16e   :  { %v2044_v49 = vpop.eup %2043 }
 0x16f   :  { %v2046_v52 = vpop.eup %2045 }
 0x1d1   :  { %v401_v50 = vpop.permute.xlu0 %400 }
 0x1d2   :  { %v406_v51 = vmul.f32 %v2044_v49, %v401_v50 }
 0x1d3   :  { %v403_v53 = vpop.permute.xlu1 %402 }
 0x1d4   :  { %410 = vrot.lane.b32.xlu1 %v406_v51, %s2310_s25  ;;  %v407_v54 = vmul.f32 %v2046_v52, %v403_v53 }
 0x1d5   :  { %v393_v56 = vpop.permute.xlu0 %392 }
 0x1d6   :  { %412 = vrot.lane.b32.xlu0 %v407_v54, %s2310_s25  ;;  %v397_v60 = vmul.f32 %v2046_v52, %v393_v56 }
 0x1d7   :  { %v391_v55 = vpop.permute.xlu1 %390 }
 0x1d8   :  { %v396_v57 = vmul.f32 %v2044_v49, %v391_v55 }
 0x246   :  { %v411_v58 = vpop.permute.xlu1 %410 }
 0x247   :  { %v2508_v59 = vadd.f32 %v411_v58, %v396_v57 }
 0x248   :  { %v413_v61 = vpop.permute.xlu0 %412 }
 0x249   :  { %2047 = vtanh.f32 %v2508_v59  ;;  %v2511_v62 = vadd.f32 %v413_v61, %v397_v60 }
 0x24b   :  { %2049 = vtanh.f32 %v2511_v62 }
 0x253   :  { %v2048_v63 = vpop.eup %2047 }
 0x254   :  { %422 = vrot.lane.b32.xlu1 %v2048_v63, %s2311_s17 }
 0x255   :  { %v2050_v0 = vpop.eup %2049 }
 0x256   :  { %424 = vrot.lane.b32.xlu0 %v2050_v0, %s2311_s17 }
 0x2c6   :  { %v423_v1 = vpop.permute.xlu1 %422 }
 0x2c7   :  { %v428_v4 = vmul.f32 %v2044_v49, %v423_v1 }
 0x2c8   :  { %v425_v3 = vpop.permute.xlu0 %424 }
 0x2c9   :  { %v429_v5 = vmul.f32 %v2046_v52, %v425_v3 }
 0x2cb   :  { %v1941_v8 = vpack.i.bf16 %v429_v5, %v428_v4 }
 0x2cd   :  { %1942 = vrot.lane.b32.xlu1 %v1941_v8, %s2310_s25 }
 0x33f   :  { %v1943_v11 = vpop.permute.xlu1 %1942 }
 0x340   :  { %v1945_v14 = vunpack.i.h.bf16 %v1943_v11  ;;  %v1944_v17 = vunpack.i.l.bf16 %v1943_v11 }
 0x342   :  { %v439_v19 = vsel %vm276_vm1, %v1945_v14, %v1940_v21  ;;  %v438_v20 = vsel %vm276_vm1, %v1944_v17, %v1939_v22 }
 0x343   :  { %v440_v23 = vpack.c.bf16 %v439_v19, %v438_v20 }
 0x345   :  { %1849 = vmatmul.mubr.msk.bf16.vlgmr.msra.gmra.mrb[4].mxu1 %vm136_vm0, %v440_v23 }
 0x346   :  { %793 = vmatpush1.bf16.msra.mxu1 %v2395_v7  ;;  %824 = vmatprep.mubr.bf16.mxu1 %v2309_v2 }
 0x347   :  { %794 = vmatprep.subr.bf16.mxu1 %v2404_v9 }
 0x34a   :  { %795 = vmatpush1.bf16.msra.mxu1 %v2410_v10 }
 0x34b   :  { %796 = vmatprep.subr.bf16.mxu1 %v2419_v12 }
 0x34e   :  { %797 = vmatpush1.bf16.msra.mxu1 %v2424_v13 }
 0x34f   :  { %798 = vmatprep.subr.bf16.mxu1 %v2435_v15 }
 0x352   :  { %799 = vmatpush1.bf16.msra.mxu1 %v2440_v16 }
 0x353   :  { %1126 = vmatprep.subr.bf16.mxu1 %v2390_v6 }
 0x418   :  { %v478_v18 = vpop.f32.mrb[4].mxu1 }
 0x419   :  { %v495_v21 = vadd.f32 %v2485_v26, %v478_v18  ;;  %v480_v22 = vpop.f32.mrb[5].mxu1 }
 0x41a   :  { %v482_v25 = vpop.f32.mrb[6].mxu1  ;;  %v493_v32 = vadd.f32 %v2537_v24, %v480_v22  ;;  %v2030_v22 = vld [vmem:[%s3016_s0 + $0x18] sm:$0xff]  }
 0x41b   :  { %v497_v27 = vadd.f32 %v2492_v30, %v495_v21  ;;  %v496_v29 = vadd.f32 %v2487_v28, %v482_v25  ;;  %v484_v31 = vpop.f32.mrb[7].mxu1  ;;  %v1815_v28 = vld [vmem:[%s3018_s6 + $0x10] sm:$0xff]  ;;  %v2031_v25 = vld [vmem:[%s3016_s0 + $0x20] sm:$0xff]  }
 0x41c   :  { %v494_v26 = vadd.f32 %v2537_v24, %v484_v31  ;;  %v1852_v41 = vmul.f32 -1.442695, %v493_v32 }
 0x41d   :  { %2051 = vtanh.f32 %v497_v27  ;;  %v498_v33 = vadd.f32 %v2492_v30, %v496_v29  ;;  %v1851_v39 = vmul.f32 -1.442695, %v497_v27 }
 0x41e   :  { %v1854_v42 = vmul.f32 -1.442695, %v494_v26 }
 0x41f   :  { %2053 = vtanh.f32 %v498_v33  ;;  %v1853_v40 = vmul.f32 -1.442695, %v498_v33 }
 0x420   :  { %2055 = vtanh.f32 %v493_v32  ;;  %v2032_v32 = vld [vmem:[%s3016_s0 + $0x28] sm:$0xff]  }
 0x421   :  { %2057 = vtanh.f32 %v494_v26  ;;  %v2033_v26 = vld [vmem:[%s3016_s0 + $0x30] sm:$0xff]  }
 0x422   :  { %2059 = vpow2.f32 %v1851_v39 }
 0x423   :  { %2061 = vpow2.f32 %v1853_v40 }
 0x424   :  { %2063 = vpow2.f32 %v1852_v41 }
 0x425   :  { %2065 = vpow2.f32 %v1854_v42 }
 0x427   :  { %v2052_v34 = vpop.eup %2051 }
 0x428   :  { %531 = vrot.lane.b32.xlu0 %v2052_v34, %s2311_s17  ;;  %v2034_v34 = vld [vmem:[%s3016_s0 + $0x38] sm:$0xff]  }
 0x429   :  { %v2054_v35 = vpop.eup %2053 }
 0x42a   :  { %v2056_v36 = vpop.eup %2055  ;;  %533 = vrot.lane.b32.xlu1 %v2054_v35, %s2311_s17 }
 0x42b   :  { %v2058_v37 = vpop.eup %2057 }
 0x42c   :  { %573 = vrot.lane.b32.xlu0 %v2056_v36, %s2311_s17  ;;  %v2060_v43 = vpop.eup %2059 }
 0x42d   :  { %v2062_v44 = vpop.eup %2061  ;;  %v511_v45 = vadd.f32 1.0, %v2060_v43 }
 0x42e   :  { %575 = vrot.lane.b32.xlu1 %v2058_v37, %s2311_s17  ;;  %v2064_v46 = vpop.eup %2063  ;;  %v513_v47 = vadd.f32 1.0, %v2062_v44 }
 0x42f   :  { %v2066_v48 = vpop.eup %2065  ;;  %2067 = vrcp.f32 %v511_v45  ;;  %v512_v49 = vadd.f32 1.0, %v2064_v46 }
 0x430   :  { %563 = vrot.lane.b32.xlu0 %v1815_v28, %s2310_s25  ;;  %2069 = vrcp.f32 %v513_v47  ;;  %v514_v50 = vadd.f32 1.0, %v2066_v48 }
 0x431   :  { %2071 = vrcp.f32 %v512_v49 }
 0x432   :  { %565 = vrot.lane.b32.xlu1 %v1816_v38, %s2310_s25  ;;  %2073 = vrcp.f32 %v514_v50 }
 0x439   :  { %v2068_v51 = vpop.eup %2067 }
 0x43a   :  { %v2070_v54 = vpop.eup %2069  ;;  %v527_v4 = vmul.f32 %v2068_v51, %v2508_v59 }
 0x43b   :  { %v2072_v56 = vpop.eup %2071  ;;  %v528_v11 = vmul.f32 %v2070_v54, %v2511_v62  ;;  %v2029_v62 = vld [vmem:[%s3016_s0 + $0x10] sm:$0xff]  }
 0x43c   :  { %v2074_v61 = vpop.eup %2073  ;;  %1920 = vmatprep.mubr.msk.bf16.mxu0 %vm136_vm0, %v2029_v62 }
 0x43d   :  { %1921 = vmatmul.mubr.msk.bf16.gmra.mrb[4].mxu0 %vm136_vm0, %v2030_v22 }
 0x43e   :  { %1924 = vmatprep.mubr.msk.bf16.mxu0 %vm136_vm0, %v2031_v25 }
 0x445   :  { %1925 = vmatmul.mubr.msk.bf16.gmra.mrb[8].mxu0 %vm136_vm0, %v2032_v32 }
 0x446   :  { %1928 = vmatprep.mubr.msk.bf16.mxu0 %vm136_vm0, %v2033_v26 }
 0x44d   :  { %1929 = vmatmul.mubr.msk.bf16.gmra.mrb[12].mxu0 %vm136_vm0, %v2034_v34 }
 0x44e   :  { %657 = vmatprep.mubr.bf16.mxu0 %v2309_v2 }
 0x49a   :  { %v532_v52 = vpop.permute.xlu0 %531 }
 0x49b   :  { %v537_v53 = vmul.f32 %v2068_v51, %v532_v52 }
 0x49c   :  { %v534_v55 = vpop.permute.xlu1 %533 }
 0x49d   :  { %541 = vrot.lane.b32.xlu0 %v537_v53, %s2310_s25  ;;  %v538_v57 = vmul.f32 %v2070_v54, %v534_v55 }
 0x49e   :  { %v574_v58 = vpop.permute.xlu0 %573 }
 0x49f   :  { %v579_v60 = vmul.f32 %v2072_v56, %v574_v58  ;;  %543 = vrot.lane.b32.xlu1 %v538_v57, %s2310_s25 }
 0x4a0   :  { %v576_v63 = vpop.permute.xlu1 %575 }
 0x4a1   :  { %583 = vrot.lane.b32.xlu0 %v579_v60, %s2310_s25  ;;  %v580_v0 = vmul.f32 %v2074_v61, %v576_v63 }
 0x4a2   :  { %v564_v1 = vpop.permute.xlu0 %563 }
 0x4a3   :  { %585 = vrot.lane.b32.xlu1 %v580_v0, %s2310_s25  ;;  %v569_v14 = vmul.f32 %v2072_v56, %v564_v1 }
 0x4a4   :  { %v566_v3 = vpop.permute.xlu1 %565 }
 0x4a5   :  { %v570_v18 = vmul.f32 %v2074_v61, %v566_v3 }
 0x50f   :  { %v542_v5 = vpop.permute.xlu0 %541 }
 0x510   :  { %v2561_v8 = vadd.f32 %v542_v5, %v527_v4  ;;  %v2605_v44 = vpop.f32.mrb[4].mxu0 }
 0x511   :  { %v544_v17 = vpop.permute.xlu1 %543  ;;  %v211_v45 = vpop.f32.mrb[5].mxu0 }
 0x512   :  { %2075 = vtanh.f32 %v2561_v8  ;;  %v2565_v19 = vadd.f32 %v544_v17, %v528_v11  ;;  %v2607_v46 = vpop.f32.mrb[6].mxu0 }
 0x513   :  { %v584_v20 = vpop.permute.xlu0 %583  ;;  %v214_v47 = vpop.f32.mrb[7].mxu0 }
 0x514   :  { %v2567_v23 = vadd.f32 %v584_v20, %v569_v14  ;;  %2077 = vtanh.f32 %v2565_v19 }
 0x515   :  { %v586_v59 = vpop.permute.xlu1 %585 }
 0x516   :  { %2079 = vtanh.f32 %v2567_v23  ;;  %v2571_v21 = vadd.f32 %v586_v59, %v570_v18 }
 0x518   :  { %2081 = vtanh.f32 %v2571_v21  ;;  %v2609_v48 = vpop.f32.mrb[8].mxu0 }
 0x519   :  { %v2611_v49 = vpop.f32.mrb[9].mxu0 }
 0x51a   :  { %v2613_v50 = vpop.f32.mrb[10].mxu0 }
 0x51c   :  { %v2076_v27 = vpop.eup %2075 }
 0x51d   :  { %553 = vrot.lane.b32.xlu0 %v2076_v27, %s2311_s17 }
 0x51e   :  { %v2078_v29 = vpop.eup %2077 }
 0x51f   :  { %555 = vrot.lane.b32.xlu1 %v2078_v29, %s2311_s17 }
 0x520   :  { %v2080_v31 = vpop.eup %2079 }
 0x521   :  { %595 = vrot.lane.b32.xlu0 %v2080_v31, %s2311_s17 }
 0x522   :  { %v2082_v33 = vpop.eup %2081 }
 0x523   :  { %597 = vrot.lane.b32.xlu1 %v2082_v33, %s2311_s17 }
 0x58f   :  { %v554_v35 = vpop.permute.xlu0 %553 }
 0x590   :  { %v559_v28 = vmul.f32 %v2068_v51, %v554_v35  ;;  %v2615_v51 = vpop.f32.mrb[11].mxu0 }
 0x591   :  { %v556_v36 = vpop.permute.xlu1 %555  ;;  %v2617_v52 = vpop.f32.mrb[12].mxu0 }
 0x592   :  { %v560_v37 = vmul.f32 %v2070_v54, %v556_v36  ;;  %v2619_v53 = vpop.f32.mrb[13].mxu0 }
 0x593   :  { %v596_v38 = vpop.permute.xlu0 %595  ;;  %v2621_v54 = vpop.f32.mrb[14].mxu0 }
 0x594   :  { %v1946_v39 = vpack.i.bf16 %v560_v37, %v559_v28  ;;  %v601_v41 = vmul.f32 %v2072_v56, %v596_v38  ;;  %v2623_v55 = vpop.f32.mrb[15].mxu0 }
 0x595   :  { %v598_v40 = vpop.permute.xlu1 %597 }
 0x596   :  { %v602_v42 = vmul.f32 %v2074_v61, %v598_v40  ;;  %1947 = vrot.lane.b32.xlu0 %v1946_v39, %s2310_s25 }
 0x598   :  { %v1951_v43 = vpack.i.bf16 %v602_v42, %v601_v41 }
 0x59a   :  { %1952 = vrot.lane.b32.xlu1 %v1951_v43, %s2311_s17 }
 0x608   :  { %v1948_v56 = vpop.permute.xlu0 %1947 }
 0x609   :  { %v1950_v58 = vunpack.i.h.bf16 %v1948_v56  ;;  %v1949_v60 = vunpack.i.l.bf16 %v1948_v56 }
 0x60c   :  { %v1953_v57 = vpop.permute.xlu1 %1952 }
 0x60d   :  { %v1955_v61 = vunpack.i.h.bf16 %v1953_v57  ;;  %v1954_v63 = vunpack.i.l.bf16 %v1953_v57 }
 0x60f   :  { %v620_v0 = vsel %vm276_vm1, %v1950_v58, %v1955_v61  ;;  %v619_v1 = vsel %vm276_vm1, %v1949_v60, %v1954_v63 }
 0x610   :  { %v621_v3 = vpack.c.bf16 %v620_v0, %v619_v1 }
 0x612   :  { %1855 = vmatmul.mubr.msk.bf16.vlgmr.msra.gmra.mrb[16].mxu0 %vm136_vm0, %v621_v3 }
 0x613   :  { %960 = vmatpush1.bf16.msra.mxu0 %v2395_v7  ;;  %991 = vmatprep.mubr.bf16.mxu0 %v2309_v2 }
 0x614   :  { %961 = vmatprep.subr.bf16.mxu0 %v2404_v9 }
 0x617   :  { %962 = vmatpush1.bf16.msra.mxu0 %v2410_v10 }
 0x618   :  { %963 = vmatprep.subr.bf16.mxu0 %v2419_v12 }
 0x61b   :  { %964 = vmatpush1.bf16.msra.mxu0 %v2424_v13 }
 0x61c   :  { %965 = vmatprep.subr.bf16.mxu0 %v2435_v15 }
 0x61f   :  { %966 = vmatpush1.bf16.msra.mxu0 %v2440_v16 }
 0x620   :  { %1293 = vmatprep.subr.bf16.mxu0 %v2390_v6 }
 0x6e5   :  { %v659_v4 = vpop.f32.mrb[16].mxu0 }
 0x6e6   :  { %v670_v5 = vadd.f32 %v659_v4, %v211_v45  ;;  %v661_v11 = vpop.f32.mrb[17].mxu0 }
 0x6e7   :  { %v663_v14 = vpop.f32.mrb[18].mxu0  ;;  %v668_v59 = vadd.f32 %v2537_v24, %v661_v11 }
 0x6e8   :  { %v672_v17 = vadd.f32 %v2492_v30, %v670_v5  ;;  %v671_v20 = vadd.f32 %v663_v14, %v214_v47  ;;  %v665_v18 = vpop.f32.mrb[19].mxu0 }
 0x6e9   :  { %v669_v22 = vadd.f32 %v2537_v24, %v665_v18  ;;  %v1857_v26 = vmul.f32 -1.442695, %v668_v59 }
 0x6ea   :  { %2083 = vtanh.f32 %v672_v17  ;;  %v673_v62 = vadd.f32 %v2492_v30, %v671_v20  ;;  %v1856_v32 = vmul.f32 -1.442695, %v672_v17 }
 0x6eb   :  { %v1859_v34 = vmul.f32 -1.442695, %v669_v22 }
 0x6ec   :  { %2085 = vtanh.f32 %v673_v62  ;;  %v1858_v33 = vmul.f32 -1.442695, %v673_v62 }
 0x6ed   :  { %2087 = vtanh.f32 %v668_v59 }
 0x6ee   :  { %2089 = vtanh.f32 %v669_v22 }
 0x6ef   :  { %2091 = vpow2.f32 %v1856_v32 }
 0x6f0   :  { %2093 = vpow2.f32 %v1858_v33 }
 0x6f1   :  { %2095 = vpow2.f32 %v1857_v26 }
 0x6f2   :  { %2097 = vpow2.f32 %v1859_v34 }
 0x6f4   :  { %v2084_v25 = vpop.eup %2083 }
 0x6f5   :  { %706 = vrot.lane.b32.xlu0 %v2084_v25, %s2311_s17 }
 0x6f6   :  { %v2086_v27 = vpop.eup %2085 }
 0x6f7   :  { %v2088_v29 = vpop.eup %2087  ;;  %708 = vrot.lane.b32.xlu1 %v2086_v27, %s2311_s17 }
 0x6f8   :  { %v2090_v31 = vpop.eup %2089 }
 0x6f9   :  { %740 = vrot.lane.b32.xlu0 %v2088_v29, %s2311_s17  ;;  %v2092_v35 = vpop.eup %2091 }
 0x6fa   :  { %v2094_v36 = vpop.eup %2093  ;;  %v686_v28 = vadd.f32 1.0, %v2092_v35 }
 0x6fb   :  { %742 = vrot.lane.b32.xlu1 %v2090_v31, %s2311_s17  ;;  %v2096_v37 = vpop.eup %2095  ;;  %v688_v38 = vadd.f32 1.0, %v2094_v36 }
 0x6fc   :  { %v2098_v39 = vpop.eup %2097  ;;  %2099 = vrcp.f32 %v686_v28  ;;  %v687_v40 = vadd.f32 1.0, %v2096_v37 }
 0x6fd   :  { %2101 = vrcp.f32 %v688_v38  ;;  %v689_v41 = vadd.f32 1.0, %v2098_v39 }
 0x6fe   :  { %2103 = vrcp.f32 %v687_v40 }
 0x6ff   :  { %2105 = vrcp.f32 %v689_v41 }
 0x706   :  { %v2100_v42 = vpop.eup %2099 }
 0x707   :  { %v2102_v47 = vpop.eup %2101  ;;  %v702_v3 = vmul.f32 %v2100_v42, %v2561_v8 }
 0x708   :  { %v2104_v57 = vpop.eup %2103  ;;  %v703_v11 = vmul.f32 %v2102_v47, %v2565_v19 }
 0x709   :  { %v2106_v63 = vpop.eup %2105  ;;  %v736_v17 = vmul.f32 %v2104_v57, %v2567_v23 }
 0x70a   :  { %v737_v62 = vmul.f32 %v2106_v63, %v2571_v21 }
 0x767   :  { %v707_v43 = vpop.permute.xlu0 %706 }
 0x768   :  { %v712_v45 = vmul.f32 %v2100_v42, %v707_v43 }
 0x769   :  { %v709_v56 = vpop.permute.xlu1 %708 }
 0x76a   :  { %716 = vrot.lane.b32.xlu0 %v712_v45, %s2310_s25  ;;  %v713_v58 = vmul.f32 %v2102_v47, %v709_v56 }
 0x76b   :  { %v741_v60 = vpop.permute.xlu0 %740 }
 0x76c   :  { %v746_v61 = vmul.f32 %v2104_v57, %v741_v60  ;;  %718 = vrot.lane.b32.xlu1 %v713_v58, %s2310_s25 }
 0x76d   :  { %v743_v0 = vpop.permute.xlu1 %742 }
 0x76e   :  { %750 = vrot.lane.b32.xlu0 %v746_v61, %s2310_s25  ;;  %v747_v1 = vmul.f32 %v2106_v63, %v743_v0 }
 0x770   :  { %752 = vrot.lane.b32.xlu1 %v747_v1, %s2310_s25 }
 0x7dc   :  { %v717_v4 = vpop.permute.xlu0 %716 }
 0x7dd   :  { %v2650_v5 = vadd.f32 %v717_v4, %v702_v3 }
 0x7de   :  { %v719_v14 = vpop.permute.xlu1 %718 }
 0x7df   :  { %2107 = vtanh.f32 %v2650_v5  ;;  %v2655_v20 = vadd.f32 %v719_v14, %v703_v11 }
 0x7e0   :  { %v751_v18 = vpop.permute.xlu0 %750 }
 0x7e1   :  { %v2657_v59 = vadd.f32 %v751_v18, %v736_v17  ;;  %2109 = vtanh.f32 %v2655_v20 }
 0x7e2   :  { %v753_v8 = vpop.permute.xlu1 %752 }
 0x7e3   :  { %2111 = vtanh.f32 %v2657_v59  ;;  %v2662_v22 = vadd.f32 %v753_v8, %v737_v62 }
 0x7e5   :  { %2113 = vtanh.f32 %v2662_v22 }
 0x7e9   :  { %v2108_v19 = vpop.eup %2107 }
 0x7ea   :  { %728 = vrot.lane.b32.xlu0 %v2108_v19, %s2311_s17 }
 0x7eb   :  { %v2110_v23 = vpop.eup %2109 }
 0x7ec   :  { %730 = vrot.lane.b32.xlu1 %v2110_v23, %s2311_s17 }
 0x7ed   :  { %v2112_v25 = vpop.eup %2111 }
 0x7ee   :  { %762 = vrot.lane.b32.xlu0 %v2112_v25, %s2311_s17 }
 0x7ef   :  { %v2114_v27 = vpop.eup %2113 }
 0x7f0   :  { %764 = vrot.lane.b32.xlu1 %v2114_v27, %s2311_s17 }
 0x85c   :  { %v729_v21 = vpop.permute.xlu0 %728 }
 0x85d   :  { %v734_v31 = vmul.f32 %v2100_v42, %v729_v21 }
 0x85e   :  { %v731_v29 = vpop.permute.xlu1 %730 }
 0x85f   :  { %v735_v32 = vmul.f32 %v2102_v47, %v731_v29 }
 0x860   :  { %v763_v33 = vpop.permute.xlu0 %762 }
 0x861   :  { %v1956_v26 = vpack.i.bf16 %v735_v32, %v734_v31  ;;  %v768_v35 = vmul.f32 %v2104_v57, %v763_v33 }
 0x862   :  { %v765_v34 = vpop.permute.xlu1 %764 }
 0x863   :  { %v769_v36 = vmul.f32 %v2106_v63, %v765_v34  ;;  %1957 = vrot.lane.b32.xlu0 %v1956_v26, %s2310_s25 }
 0x865   :  { %v1961_v28 = vpack.i.bf16 %v769_v36, %v768_v35 }
 0x867   :  { %1962 = vrot.lane.b32.xlu1 %v1961_v28, %s2311_s17 }
 0x8d5   :  { %v1958_v37 = vpop.permute.xlu0 %1957 }
 0x8d6   :  { %v1960_v39 = vunpack.i.h.bf16 %v1958_v37  ;;  %v1959_v40 = vunpack.i.l.bf16 %v1958_v37 }
 0x8d9   :  { %v1963_v38 = vpop.permute.xlu1 %1962 }
 0x8da   :  { %v1965_v41 = vunpack.i.h.bf16 %v1963_v38  ;;  %v1964_v43 = vunpack.i.l.bf16 %v1963_v38 }
 0x8dc   :  { %v787_v45 = vsel %vm276_vm1, %v1960_v39, %v1965_v41  ;;  %v786_v42 = vsel %vm276_vm1, %v1959_v40, %v1964_v43 }
 0x8dd   :  { %v788_v47 = vpack.c.bf16 %v787_v45, %v786_v42 }
 0x8df   :  { %1860 = vmatmul.mubr.msk.bf16.vlgmr.msra.gmra.mrb[8].mxu1 %vm136_vm0, %v788_v47 }
 0x8e0   :  { %1127 = vmatpush1.bf16.msra.mxu1 %v2395_v7  ;;  %1158 = vmatprep.mubr.bf16.mxu1 %v2309_v2 }
 0x8e1   :  { %1128 = vmatprep.subr.bf16.mxu1 %v2404_v9 }
 0x8e4   :  { %1129 = vmatpush1.bf16.msra.mxu1 %v2410_v10 }
 0x8e5   :  { %1130 = vmatprep.subr.bf16.mxu1 %v2419_v12 }
 0x8e8   :  { %1131 = vmatpush1.bf16.msra.mxu1 %v2424_v13 }
 0x8e9   :  { %1132 = vmatprep.subr.bf16.mxu1 %v2435_v15 }
 0x8ec   :  { %1133 = vmatpush1.bf16.msra.mxu1 %v2440_v16 }
 0x8ed   :  { %1460 = vmatprep.subr.bf16.mxu1 %v2390_v6 }
 0x9b2   :  { %v826_v56 = vpop.f32.mrb[8].mxu1 }
 0x9b3   :  { %v837_v57 = vadd.f32 %v2605_v44, %v826_v56  ;;  %v828_v7 = vpop.f32.mrb[9].mxu1 }
 0x9b4   :  { %v830_v58 = vpop.f32.mrb[10].mxu1  ;;  %v835_v12 = vadd.f32 %v2537_v24, %v828_v7 }
 0x9b5   :  { %v839_v60 = vadd.f32 %v2492_v30, %v837_v57  ;;  %v838_v9 = vadd.f32 %v2607_v46, %v830_v58  ;;  %v832_v10 = vpop.f32.mrb[11].mxu1 }
 0x9b6   :  { %v836_v63 = vadd.f32 %v2537_v24, %v832_v10  ;;  %v1862_v4 = vmul.f32 -1.442695, %v835_v12 }
 0x9b7   :  { %2115 = vtanh.f32 %v839_v60  ;;  %v840_v61 = vadd.f32 %v2492_v30, %v838_v9  ;;  %v1861_v1 = vmul.f32 -1.442695, %v839_v60 }
 0x9b8   :  { %v1864_v11 = vmul.f32 -1.442695, %v836_v63 }
 0x9b9   :  { %2117 = vtanh.f32 %v840_v61  ;;  %v1863_v3 = vmul.f32 -1.442695, %v840_v61 }
 0x9ba   :  { %2119 = vtanh.f32 %v835_v12 }
 0x9bb   :  { %2121 = vtanh.f32 %v836_v63 }
 0x9bc   :  { %2123 = vpow2.f32 %v1861_v1 }
 0x9bd   :  { %2125 = vpow2.f32 %v1863_v3 }
 0x9be   :  { %2127 = vpow2.f32 %v1862_v4 }
 0x9bf   :  { %2129 = vpow2.f32 %v1864_v11 }
 0x9c1   :  { %v2116_v6 = vpop.eup %2115 }
 0x9c2   :  { %873 = vrot.lane.b32.xlu0 %v2116_v6, %s2311_s17 }
 0x9c3   :  { %v2118_v44 = vpop.eup %2117 }
 0x9c4   :  { %v2120_v0 = vpop.eup %2119  ;;  %875 = vrot.lane.b32.xlu1 %v2118_v44, %s2311_s17 }
 0x9c5   :  { %v2122_v46 = vpop.eup %2121 }
 0x9c6   :  { %907 = vrot.lane.b32.xlu0 %v2120_v0, %s2311_s17  ;;  %v2124_v14 = vpop.eup %2123 }
 0x9c7   :  { %v2126_v17 = vpop.eup %2125  ;;  %v853_v18 = vadd.f32 1.0, %v2124_v14 }
 0x9c8   :  { %909 = vrot.lane.b32.xlu1 %v2122_v46, %s2311_s17  ;;  %v2128_v62 = vpop.eup %2127  ;;  %v855_v8 = vadd.f32 1.0, %v2126_v17 }
 0x9c9   :  { %v2130_v19 = vpop.eup %2129  ;;  %2131 = vrcp.f32 %v853_v18  ;;  %v854_v23 = vadd.f32 1.0, %v2128_v62 }
 0x9ca   :  { %2133 = vrcp.f32 %v855_v8  ;;  %v856_v25 = vadd.f32 1.0, %v2130_v19  ;;  %v2725_v19 = vld [vmem:[%s3015_s2] ss:$8 sps:$4 sm:$0xff]  }
 0x9cb   :  { %2135 = vrcp.f32 %v854_v23  ;;  %v2732_v23 = vld [vmem:[%s3015_s2 + $0x14] ss:$8 sps:$4 sm:$0xff]  }
 0x9cc   :  { %2137 = vrcp.f32 %v856_v25  ;;  %v2738_v25 = vld [vmem:[%s3015_s2 + $0x10] ss:$8 sps:$4 sm:$0xff]  }
 0x9d3   :  { %v2132_v27 = vpop.eup %2131 }
 0x9d4   :  { %v2134_v31 = vpop.eup %2133  ;;  %v869_v38 = vmul.f32 %v2132_v27, %v2650_v5 }
 0x9d5   :  { %v2136_v33 = vpop.eup %2135  ;;  %v870_v41 = vmul.f32 %v2134_v31, %v2655_v20 }
 0x9d6   :  { %v2138_v36 = vpop.eup %2137  ;;  %v903_v45 = vmul.f32 %v2136_v33, %v2657_v59 }
 0x9d7   :  { %v904_v57 = vmul.f32 %v2138_v36, %v2662_v22 }
 0xa34   :  { %v874_v21 = vpop.permute.xlu0 %873 }
 0xa35   :  { %v879_v29 = vmul.f32 %v2132_v27, %v874_v21  ;;  %v2303_v21 = vld [vmem:[%s3015_s2 + $0x4] ss:$8 sps:$4 sm:$0xff]  }
 0xa36   :  { %v876_v32 = vpop.permute.xlu1 %875 }
 0xa37   :  { %883 = vrot.lane.b32.xlu0 %v879_v29, %s2310_s25  ;;  %v880_v26 = vmul.f32 %v2134_v31, %v876_v32 }
 0xa38   :  { %v908_v34 = vpop.permute.xlu0 %907 }
 0xa39   :  { %v913_v35 = vmul.f32 %v2136_v33, %v908_v34  ;;  %885 = vrot.lane.b32.xlu1 %v880_v26, %s2310_s25 }
 0xa3a   :  { %v910_v28 = vpop.permute.xlu1 %909 }
 0xa3b   :  { %917 = vrot.lane.b32.xlu0 %v913_v35, %s2310_s25  ;;  %v914_v37 = vmul.f32 %v2138_v36, %v910_v28 }
 0xa3d   :  { %919 = vrot.lane.b32.xlu1 %v914_v37, %s2310_s25 }
 0xaa9   :  { %v884_v39 = vpop.permute.xlu0 %883 }
 0xaaa   :  { %v2698_v40 = vadd.f32 %v884_v39, %v869_v38 }
 0xaab   :  { %v886_v43 = vpop.permute.xlu1 %885 }
 0xaac   :  { %2139 = vtanh.f32 %v2698_v40  ;;  %v2703_v42 = vadd.f32 %v886_v43, %v870_v41 }
 0xaad   :  { %v918_v47 = vpop.permute.xlu0 %917 }
 0xaae   :  { %v2705_v56 = vadd.f32 %v918_v47, %v903_v45  ;;  %2141 = vtanh.f32 %v2703_v42 }
 0xaaf   :  { %v920_v5 = vpop.permute.xlu1 %919 }
 0xab0   :  { %2143 = vtanh.f32 %v2705_v56  ;;  %v2710_v7 = vadd.f32 %v920_v5, %v904_v57 }
 0xab2   :  { %2145 = vtanh.f32 %v2710_v7 }
 0xab6   :  { %v2140_v20 = vpop.eup %2139 }
 0xab7   :  { %895 = vrot.lane.b32.xlu0 %v2140_v20, %s2311_s17 }
 0xab8   :  { %v2142_v59 = vpop.eup %2141 }
 0xab9   :  { %897 = vrot.lane.b32.xlu1 %v2142_v59, %s2311_s17 }
 0xaba   :  { %v2144_v58 = vpop.eup %2143 }
 0xabb   :  { %929 = vrot.lane.b32.xlu0 %v2144_v58, %s2311_s17 }
 0xabc   :  { %v2146_v60 = vpop.eup %2145 }
 0xabd   :  { %931 = vrot.lane.b32.xlu1 %v2146_v60, %s2311_s17 }
 0xb29   :  { %v896_v22 = vpop.permute.xlu0 %895 }
 0xb2a   :  { %v901_v10 = vmul.f32 %v2132_v27, %v896_v22  ;;  %v2744_v27 = vld [vmem:[%s3015_s2 + $0x24] ss:$8 sps:$4 sm:$0xff]  }
 0xb2b   :  { %v898_v9 = vpop.permute.xlu1 %897 }
 0xb2c   :  { %v902_v12 = vmul.f32 %v2134_v31, %v898_v9 }
 0xb2d   :  { %v930_v61 = vpop.permute.xlu0 %929 }
 0xb2e   :  { %v1966_v63 = vpack.i.bf16 %v902_v12, %v901_v10  ;;  %v935_v44 = vmul.f32 %v2136_v33, %v930_v61 }
 0xb2f   :  { %v932_v6 = vpop.permute.xlu1 %931 }
 0xb30   :  { %v936_v0 = vmul.f32 %v2138_v36, %v932_v6  ;;  %1967 = vrot.lane.b32.xlu0 %v1966_v63, %s2310_s25 }
 0xb32   :  { %v1971_v46 = vpack.i.bf16 %v936_v0, %v935_v44 }
 0xb34   :  { %1972 = vrot.lane.b32.xlu1 %v1971_v46, %s2311_s17 }
 0xba2   :  { %v1968_v1 = vpop.permute.xlu0 %1967 }
 0xba3   :  { %v1970_v4 = vunpack.i.h.bf16 %v1968_v1  ;;  %v1969_v11 = vunpack.i.l.bf16 %v1968_v1 }
 0xba6   :  { %v1973_v3 = vpop.permute.xlu1 %1972 }
 0xba7   :  { %v1975_v14 = vunpack.i.h.bf16 %v1973_v3  ;;  %v1974_v17 = vunpack.i.l.bf16 %v1973_v3 }
 0xba9   :  { %v954_v18 = vsel %vm276_vm1, %v1970_v4, %v1975_v14  ;;  %v953_v62 = vsel %vm276_vm1, %v1969_v11, %v1974_v17 }
 0xbaa   :  { %v955_v8 = vpack.c.bf16 %v954_v18, %v953_v62 }
 0xbac   :  { %1865 = vmatmul.mubr.msk.bf16.vlgmr.msra.gmra.mrb[20].mxu0 %vm136_vm0, %v955_v8 }
 0xbad   :  { %1294 = vmatpush1.bf16.msra.mxu0 %v2725_v19  ;;  %1325 = vmatprep.mubr.bf16.mxu0 %v2309_v2 }
 0xbae   :  { %1295 = vmatprep.subr.bf16.mxu0 %v2732_v23 }
 0xbb1   :  { %1296 = vmatpush1.bf16.msra.mxu0 %v2738_v25 }
 0xbb2   :  { %1297 = vmatprep.subr.bf16.mxu0 %v2744_v27 }
 0xbb5   :  { %1298 = vmatpush1.bf16.msra.mxu0 %v2424_v13 }
 0xbb6   :  { %1299 = vmatprep.subr.bf16.mxu0 %v2435_v15 }
 0xbb9   :  { %1300 = vmatpush1.bf16.msra.mxu0 %v2440_v16 }
 0xbba   :  { %1627 = vmatprep.subr.bf16.mxu0 %v2303_v21 }
 0xc7f   :  { %v993_v29 = vpop.f32.mrb[20].mxu0 }
 0xc80   :  { %v1004_v31 = vadd.f32 %v993_v29, %v2611_v49  ;;  %v995_v32 = vpop.f32.mrb[21].mxu0 }
 0xc81   :  { %v997_v33 = vpop.f32.mrb[22].mxu0  ;;  %v1002_v13 = vadd.f32 %v2537_v24, %v995_v32 }
 0xc82   :  { %v1006_v26 = vadd.f32 %v2492_v30, %v1004_v31  ;;  %v1005_v34 = vadd.f32 %v997_v33, %v2615_v51  ;;  %v999_v35 = vpop.f32.mrb[23].mxu0 }
 0xc83   :  { %v1003_v16 = vadd.f32 %v2537_v24, %v999_v35 }
 0xc84   :  { %2147 = vtanh.f32 %v1006_v26  ;;  %v1007_v15 = vadd.f32 %v2492_v30, %v1005_v34  ;;  %v1866_v37 = vmul.f32 -1.442695, %v1006_v26  ;;  %v1867_v30 = vmul.f32 -1.442695, %v1002_v13 }
 0xc85   :  { %v1869_v39 = vmul.f32 -1.442695, %v1003_v16 }
 0xc86   :  { %2149 = vtanh.f32 %v1007_v15  ;;  %v1868_v38 = vmul.f32 -1.442695, %v1007_v15 }
 0xc87   :  { %2151 = vtanh.f32 %v1002_v13 }
 0xc88   :  { %2153 = vtanh.f32 %v1003_v16 }
 0xc89   :  { %2155 = vpow2.f32 %v1866_v37 }
 0xc8a   :  { %2157 = vpow2.f32 %v1868_v38 }
 0xc8b   :  { %2159 = vpow2.f32 %v1867_v30 }
 0xc8c   :  { %2161 = vpow2.f32 %v1869_v39 }
 0xc8e   :  { %v2148_v36 = vpop.eup %2147 }
 0xc8f   :  { %1040 = vrot.lane.b32.xlu0 %v2148_v36, %s2311_s17 }
 0xc90   :  { %v2150_v49 = vpop.eup %2149 }
 0xc91   :  { %v2152_v28 = vpop.eup %2151  ;;  %1042 = vrot.lane.b32.xlu1 %v2150_v49, %s2311_s17 }
 0xc92   :  { %v2154_v51 = vpop.eup %2153 }
 0xc93   :  { %1074 = vrot.lane.b32.xlu0 %v2152_v28, %s2311_s17  ;;  %v2156_v41 = vpop.eup %2155 }
 0xc94   :  { %v2158_v43 = vpop.eup %2157  ;;  %v1020_v45 = vadd.f32 1.0, %v2156_v41 }
 0xc95   :  { %1076 = vrot.lane.b32.xlu1 %v2154_v51, %s2311_s17  ;;  %v2160_v47 = vpop.eup %2159  ;;  %v1022_v57 = vadd.f32 1.0, %v2158_v43 }
 0xc96   :  { %v2162_v5 = vpop.eup %2161  ;;  %2163 = vrcp.f32 %v1020_v45  ;;  %v1021_v20 = vadd.f32 1.0, %v2160_v47  ;;  %v2800_v47 = vld [vmem:[%s3015_s2 + $0x20] ss:$8 sps:$4 sm:$0xff]  }
 0xc97   :  { %2165 = vrcp.f32 %v1022_v57  ;;  %v1023_v59 = vadd.f32 1.0, %v2162_v5  ;;  %v2806_v57 = vld [vmem:[%s3015_s2 + $0x34] ss:$8 sps:$4 sm:$0xff]   ;;  %v2812_v5 = vld [vmem:[%s3015_s2 + $0x30] ss:$8 sps:$4 sm:$0xff]  }
 0xc98   :  { %2167 = vrcp.f32 %v1021_v20 }
 0xc99   :  { %2169 = vrcp.f32 %v1023_v59 }
 0xca0   :  { %v2164_v58 = vpop.eup %2163 }
 0xca1   :  { %v2166_v9 = vpop.eup %2165  ;;  %v1036_v1 = vmul.f32 %v2164_v58, %v2698_v40 }
 0xca2   :  { %v2168_v12 = vpop.eup %2167  ;;  %v1037_v11 = vmul.f32 %v2166_v9, %v2703_v42 }
 0xca3   :  { %v2170_v44 = vpop.eup %2169  ;;  %v1070_v17 = vmul.f32 %v2168_v12, %v2705_v56 }
 0xca4   :  { %v1071_v21 = vmul.f32 %v2170_v44, %v2710_v7 }
 0xd01   :  { %v1041_v60 = vpop.permute.xlu0 %1040 }
 0xd02   :  { %v1046_v22 = vmul.f32 %v2164_v58, %v1041_v60 }
 0xd03   :  { %v1043_v10 = vpop.permute.xlu1 %1042 }
 0xd04   :  { %1050 = vrot.lane.b32.xlu0 %v1046_v22, %s2310_s25  ;;  %v1047_v61 = vmul.f32 %v2166_v9, %v1043_v10  ;;  %v2819_v22 = vld [vmem:[%s3017_s3] ss:$0 sm:$0xff] }
 0xd05   :  { %v1075_v63 = vpop.permute.xlu0 %1074 }
 0xd06   :  { %v1080_v6 = vmul.f32 %v2168_v12, %v1075_v63  ;;  %1052 = vrot.lane.b32.xlu1 %v1047_v61, %s2310_s25 }
 0xd07   :  { %v1077_v0 = vpop.permute.xlu1 %1076 }
 0xd08   :  { %1084 = vrot.lane.b32.xlu0 %v1080_v6, %s2310_s25  ;;  %v1081_v46 = vmul.f32 %v2170_v44, %v1077_v0 }
 0xd0a   :  { %1086 = vrot.lane.b32.xlu1 %v1081_v46, %s2310_s25 }
 0xd76   :  { %v1051_v3 = vpop.permute.xlu0 %1050 }
 0xd77   :  { %v2768_v4 = vadd.f32 %v1051_v3, %v1036_v1 }
 0xd78   :  { %v1053_v14 = vpop.permute.xlu1 %1052 }
 0xd79   :  { %2171 = vtanh.f32 %v2768_v4  ;;  %v2773_v18 = vadd.f32 %v1053_v14, %v1037_v11 }
 0xd7a   :  { %v1085_v62 = vpop.permute.xlu0 %1084 }
 0xd7b   :  { %v2775_v8 = vadd.f32 %v1085_v62, %v1070_v17  ;;  %2173 = vtanh.f32 %v2773_v18 }
 0xd7c   :  { %v1087_v40 = vpop.permute.xlu1 %1086 }
 0xd7d   :  { %2175 = vtanh.f32 %v2775_v8  ;;  %v2780_v29 = vadd.f32 %v1087_v40, %v1071_v21 }
 0xd7f   :  { %2177 = vtanh.f32 %v2780_v29 }
 0xd83   :  { %v2172_v42 = vpop.eup %2171 }
 0xd84   :  { %1062 = vrot.lane.b32.xlu0 %v2172_v42, %s2311_s17 }
 0xd85   :  { %v2174_v56 = vpop.eup %2173 }
 0xd86   :  { %1064 = vrot.lane.b32.xlu1 %v2174_v56, %s2311_s17 }
 0xd87   :  { %v2176_v31 = vpop.eup %2175 }
 0xd88   :  { %1096 = vrot.lane.b32.xlu0 %v2176_v31, %s2311_s17 }
 0xd89   :  { %v2178_v32 = vpop.eup %2177 }
 0xd8a   :  { %1098 = vrot.lane.b32.xlu1 %v2178_v32, %s2311_s17 }
 0xdf6   :  { %v1063_v7 = vpop.permute.xlu0 %1062 }
 0xdf7   :  { %v1068_v26 = vmul.f32 %v2164_v58, %v1063_v7 }
 0xdf8   :  { %v1065_v33 = vpop.permute.xlu1 %1064 }
 0xdf9   :  { %v1069_v34 = vmul.f32 %v2166_v9, %v1065_v33 }
 0xdfa   :  { %v1097_v35 = vpop.permute.xlu0 %1096 }
 0xdfb   :  { %v1976_v13 = vpack.i.bf16 %v1069_v34, %v1068_v26  ;;  %v1102_v16 = vmul.f32 %v2168_v12, %v1097_v35 }
 0xdfc   :  { %v1099_v15 = vpop.permute.xlu1 %1098 }
 0xdfd   :  { %v1103_v36 = vmul.f32 %v2170_v44, %v1099_v15  ;;  %1977 = vrot.lane.b32.xlu0 %v1976_v13, %s2310_s25 }
 0xdff   :  { %v1981_v49 = vpack.i.bf16 %v1103_v36, %v1102_v16 }
 0xe01   :  { %1982 = vrot.lane.b32.xlu1 %v1981_v49, %s2311_s17 }
 0xe6f   :  { %v1978_v28 = vpop.permute.xlu0 %1977 }
 0xe70   :  { %v1980_v37 = vunpack.i.h.bf16 %v1978_v28  ;;  %v1979_v38 = vunpack.i.l.bf16 %v1978_v28 }
 0xe73   :  { %v1983_v51 = vpop.permute.xlu1 %1982 }
 0xe74   :  { %v1985_v30 = vunpack.i.h.bf16 %v1983_v51  ;;  %v1984_v39 = vunpack.i.l.bf16 %v1983_v51 }
 0xe76   :  { %v1121_v41 = vsel %vm276_vm1, %v1980_v37, %v1985_v30  ;;  %v1120_v43 = vsel %vm276_vm1, %v1979_v38, %v1984_v39 }
 0xe77   :  { %v1122_v45 = vpack.c.bf16 %v1121_v41, %v1120_v43 }
 0xe79   :  { %1870 = vmatmul.mubr.msk.bf16.vlgmr.msra.gmra.mrb[12].mxu1 %vm136_vm0, %v1122_v45 }
 0xe7a   :  { %1461 = vmatpush1.bf16.msra.mxu1 %v2725_v19  ;;  %1492 = vmatprep.mubr.bf16.mxu1 %v2309_v2 }
 0xe7b   :  { %1462 = vmatprep.subr.bf16.mxu1 %v2732_v23 }
 0xe7e   :  { %1463 = vmatpush1.bf16.msra.mxu1 %v2738_v25 }
 0xe7f   :  { %1464 = vmatprep.subr.bf16.mxu1 %v2744_v27 }
 0xe82   :  { %1465 = vmatpush1.bf16.msra.mxu1 %v2800_v47 }
 0xe83   :  { %1466 = vmatprep.subr.bf16.mxu1 %v2806_v57 }
 0xe86   :  { %1467 = vmatpush1.bf16.msra.mxu1 %v2812_v5 }
 0xf4c   :  { %v1160_v20 = vpop.f32.mrb[12].mxu1 }
 0xf4d   :  { %v1171_v59 = vadd.f32 %v2609_v48, %v1160_v20  ;;  %v1162_v58 = vpop.f32.mrb[13].mxu1 }
 0xf4e   :  { %v1164_v60 = vpop.f32.mrb[14].mxu1  ;;  %v1169_v61 = vadd.f32 %v2537_v24, %v1162_v58 }
 0xf4f   :  { %v1173_v9 = vadd.f32 %v2819_v22, %v1171_v59  ;;  %v1172_v10 = vadd.f32 %v2613_v50, %v1164_v60  ;;  %v1166_v12 = vpop.f32.mrb[15].mxu1 }
 0xf50   :  { %v1170_v48 = vadd.f32 %v2537_v24, %v1166_v12  ;;  %v1872_v3 = vmul.f32 -1.442695, %v1169_v61 }
 0xf51   :  { %2179 = vtanh.f32 %v1173_v9  ;;  %v1174_v63 = vadd.f32 %v2819_v22, %v1172_v10  ;;  %v1871_v46 = vmul.f32 -1.442695, %v1173_v9 }
 0xf52   :  { %v1874_v24 = vmul.f32 -1.442695, %v1170_v48 }
 0xf53   :  { %2181 = vtanh.f32 %v1174_v63  ;;  %v1873_v1 = vmul.f32 -1.442695, %v1174_v63 }
 0xf54   :  { %2183 = vtanh.f32 %v1169_v61 }
 0xf55   :  { %2185 = vtanh.f32 %v1170_v48 }
 0xf56   :  { %2187 = vpow2.f32 %v1871_v46 }
 0xf57   :  { %2189 = vpow2.f32 %v1873_v1 }
 0xf58   :  { %2191 = vpow2.f32 %v1872_v3 }
 0xf59   :  { %2193 = vpow2.f32 %v1874_v24 }
 0xf5b   :  { %v2180_v6 = vpop.eup %2179 }
 0xf5c   :  { %1207 = vrot.lane.b32.xlu0 %v2180_v6, %s2311_s17 }
 0xf5d   :  { %v2182_v44 = vpop.eup %2181 }
 0xf5e   :  { %v2184_v0 = vpop.eup %2183  ;;  %1209 = vrot.lane.b32.xlu1 %v2182_v44, %s2311_s17 }
 0xf5f   :  { %v2186_v50 = vpop.eup %2185 }
 0xf60   :  { %1241 = vrot.lane.b32.xlu0 %v2184_v0, %s2311_s17  ;;  %v2188_v11 = vpop.eup %2187 }
 0xf61   :  { %v2190_v14 = vpop.eup %2189  ;;  %v1187_v17 = vadd.f32 1.0, %v2188_v11 }
 0xf62   :  { %1243 = vrot.lane.b32.xlu1 %v2186_v50, %s2311_s17  ;;  %v2192_v62 = vpop.eup %2191  ;;  %v1189_v21 = vadd.f32 1.0, %v2190_v14 }
 0xf63   :  { %v2194_v40 = vpop.eup %2193  ;;  %2195 = vrcp.f32 %v1187_v17  ;;  %v1188_v42 = vadd.f32 1.0, %v2192_v62 }
 0xf64   :  { %2197 = vrcp.f32 %v1189_v21  ;;  %v1190_v56 = vadd.f32 1.0, %v2194_v40 }
 0xf65   :  { %2199 = vrcp.f32 %v1188_v42 }
 0xf66   :  { %2201 = vrcp.f32 %v1190_v56 }
 0xf6d   :  { %v2196_v31 = vpop.eup %2195 }
 0xf6e   :  { %v2198_v33 = vpop.eup %2197  ;;  %v1203_v28 = vmul.f32 %v2196_v31, %v2768_v4 }
 0xf6f   :  { %v2200_v34 = vpop.eup %2199  ;;  %v1204_v38 = vmul.f32 %v2198_v33, %v2773_v18 }
 0xf70   :  { %v2202_v16 = vpop.eup %2201  ;;  %v1237_v39 = vmul.f32 %v2200_v34, %v2775_v8 }
 0xf71   :  { %v1238_v20 = vmul.f32 %v2202_v16, %v2780_v29 }
 0xfce   :  { %v1208_v32 = vpop.permute.xlu0 %1207 }
 0xfcf   :  { %v1213_v7 = vmul.f32 %v2196_v31, %v1208_v32 }
 0xfd0   :  { %v1210_v26 = vpop.permute.xlu1 %1209 }
 0xfd1   :  { %1217 = vrot.lane.b32.xlu0 %v1213_v7, %s2310_s25  ;;  %v1214_v35 = vmul.f32 %v2198_v33, %v1210_v26 }
 0xfd2   :  { %v1242_v13 = vpop.permute.xlu0 %1241 }
 0xfd3   :  { %v1247_v15 = vmul.f32 %v2200_v34, %v1242_v13  ;;  %1219 = vrot.lane.b32.xlu1 %v1214_v35, %s2310_s25 }
 0xfd4   :  { %v1244_v36 = vpop.permute.xlu1 %1243 }
 0xfd5   :  { %1251 = vrot.lane.b32.xlu0 %v1247_v15, %s2310_s25  ;;  %v1248_v49 = vmul.f32 %v2202_v16, %v1244_v36 }
 0xfd7   :  { %1253 = vrot.lane.b32.xlu1 %v1248_v49, %s2310_s25 }
0x1043   :  { %v1218_v51 = vpop.permute.xlu0 %1217 }
0x1044   :  { %v2835_v37 = vadd.f32 %v1218_v51, %v1203_v28 }
0x1045   :  { %v1220_v30 = vpop.permute.xlu1 %1219 }
0x1046   :  { %2203 = vtanh.f32 %v2835_v37  ;;  %v2840_v41 = vadd.f32 %v1220_v30, %v1204_v38 }
0x1047   :  { %v1252_v43 = vpop.permute.xlu0 %1251 }
0x1048   :  { %v2842_v45 = vadd.f32 %v1252_v43, %v1237_v39  ;;  %2205 = vtanh.f32 %v2840_v41 }
0x1049   :  { %v1254_v4 = vpop.permute.xlu1 %1253 }
0x104a   :  { %2207 = vtanh.f32 %v2842_v45  ;;  %v2847_v59 = vadd.f32 %v1254_v4, %v1238_v20 }
0x104c   :  { %2209 = vtanh.f32 %v2847_v59 }
0x1050   :  { %v2204_v18 = vpop.eup %2203 }
0x1051   :  { %1229 = vrot.lane.b32.xlu0 %v2204_v18, %s2311_s17 }
0x1052   :  { %v2206_v8 = vpop.eup %2205 }
0x1053   :  { %1231 = vrot.lane.b32.xlu1 %v2206_v8, %s2311_s17 }
0x1054   :  { %v2208_v58 = vpop.eup %2207 }
0x1055   :  { %1263 = vrot.lane.b32.xlu0 %v2208_v58, %s2311_s17 }
0x1056   :  { %v2210_v60 = vpop.eup %2209 }
0x1057   :  { %1265 = vrot.lane.b32.xlu1 %v2210_v60, %s2311_s17 }
0x10c3   :  { %v1230_v29 = vpop.permute.xlu0 %1229 }
0x10c4   :  { %v1235_v10 = vmul.f32 %v2196_v31, %v1230_v29 }
0x10c5   :  { %v1232_v9 = vpop.permute.xlu1 %1231 }
0x10c6   :  { %v1236_v12 = vmul.f32 %v2198_v33, %v1232_v9 }
0x10c7   :  { %v1264_v61 = vpop.permute.xlu0 %1263 }
0x10c8   :  { %v1986_v63 = vpack.i.bf16 %v1236_v12, %v1235_v10  ;;  %v1269_v6 = vmul.f32 %v2200_v34, %v1264_v61 }
0x10c9   :  { %v1266_v48 = vpop.permute.xlu1 %1265 }
0x10ca   :  { %v1270_v44 = vmul.f32 %v2202_v16, %v1266_v48  ;;  %1987 = vrot.lane.b32.xlu0 %v1986_v63, %s2310_s25 }
0x10cc   :  { %v1991_v0 = vpack.i.bf16 %v1270_v44, %v1269_v6 }
0x10ce   :  { %1992 = vrot.lane.b32.xlu1 %v1991_v0, %s2311_s17 }
0x113c   :  { %v1988_v50 = vpop.permute.xlu0 %1987 }
0x113d   :  { %v1990_v1 = vunpack.i.h.bf16 %v1988_v50  ;;  %v1989_v3 = vunpack.i.l.bf16 %v1988_v50 }
0x1140   :  { %v1993_v46 = vpop.permute.xlu1 %1992 }
0x1141   :  { %v1995_v24 = vunpack.i.h.bf16 %v1993_v46  ;;  %v1994_v11 = vunpack.i.l.bf16 %v1993_v46 }
0x1143   :  { %v1288_v14 = vsel %vm276_vm1, %v1990_v1, %v1995_v24  ;;  %v1287_v17 = vsel %vm276_vm1, %v1989_v3, %v1994_v11 }
0x1144   :  { %v1289_v62 = vpack.c.bf16 %v1288_v14, %v1287_v17 }
0x1146   :  { %1875 = vmatmul.mubr.msk.bf16.vlgmr.msra.gmra.mrb[24].mxu0 %vm136_vm0, %v1289_v62 }
0x1147   :  { %1628 = vmatpush1.bf16.msra.mxu0 %v2725_v19  ;;  %1659 = vmatprep.mubr.bf16.mxu0 %v2309_v2 }
0x1148   :  { %1629 = vmatprep.subr.bf16.mxu0 %v2732_v23 }
0x114b   :  { %1630 = vmatpush1.bf16.msra.mxu0 %v2738_v25  ;;  %v2873_v25 = vld [vmem:[%s3019_s4] ss:$0 sm:$0xff] }
0x114c   :  { %1631 = vmatprep.subr.bf16.mxu0 %v2744_v27 }
0x114f   :  { %1632 = vmatpush1.bf16.msra.mxu0 %v2800_v47 }
0x1150   :  { %1633 = vmatprep.subr.bf16.mxu0 %v2806_v57 }
0x1153   :  { %1634 = vmatpush1.bf16.msra.mxu0 %v2812_v5 }
0x1219   :  { %v1327_v21 = vpop.f32.mrb[24].mxu0 }
0x121a   :  { %v1338_v40 = vadd.f32 %v1327_v21, %v2619_v53  ;;  %v1329_v42 = vpop.f32.mrb[25].mxu0 }
0x121b   :  { %v1331_v56 = vpop.f32.mrb[26].mxu0  ;;  %v1336_v27 = vadd.f32 %v2873_v25, %v1329_v42 }
0x121c   :  { %v1340_v19 = vadd.f32 %v2819_v22, %v1338_v40  ;;  %v1339_v2 = vadd.f32 %v1331_v56, %v2623_v55  ;;  %v1333_v23 = vpop.f32.mrb[27].mxu0 }
0x121d   :  { %v1337_v53 = vadd.f32 %v2873_v25, %v1333_v23  ;;  %v1877_v33 = vmul.f32 -1.442695, %v1336_v27 }
0x121e   :  { %2211 = vtanh.f32 %v1340_v19  ;;  %v1341_v47 = vadd.f32 %v2819_v22, %v1339_v2  ;;  %v1876_v32 = vmul.f32 -1.442695, %v1340_v19 }
0x121f   :  { %v1879_v26 = vmul.f32 -1.442695, %v1337_v53 }
0x1220   :  { %2213 = vtanh.f32 %v1341_v47  ;;  %v1878_v7 = vmul.f32 -1.442695, %v1341_v47 }
0x1221   :  { %2215 = vtanh.f32 %v1336_v27 }
0x1222   :  { %2217 = vtanh.f32 %v1337_v53 }
0x1223   :  { %2219 = vpow2.f32 %v1876_v32 }
0x1224   :  { %2221 = vpow2.f32 %v1878_v7 }
0x1225   :  { %2223 = vpow2.f32 %v1877_v33 }
0x1226   :  { %2225 = vpow2.f32 %v1879_v26 }
0x1228   :  { %v2212_v57 = vpop.eup %2211 }
0x1229   :  { %1374 = vrot.lane.b32.xlu0 %v2212_v57, %s2311_s17 }
0x122a   :  { %v2214_v55 = vpop.eup %2213 }
0x122b   :  { %v2216_v5 = vpop.eup %2215  ;;  %1376 = vrot.lane.b32.xlu1 %v2214_v55, %s2311_s17 }
0x122c   :  { %v2218_v31 = vpop.eup %2217 }
0x122d   :  { %1408 = vrot.lane.b32.xlu0 %v2216_v5, %s2311_s17  ;;  %v2220_v34 = vpop.eup %2219 }
0x122e   :  { %v2222_v35 = vpop.eup %2221  ;;  %v1354_v13 = vadd.f32 1.0, %v2220_v34 }
0x122f   :  { %1410 = vrot.lane.b32.xlu1 %v2218_v31, %s2311_s17  ;;  %v2224_v15 = vpop.eup %2223  ;;  %v1356_v16 = vadd.f32 1.0, %v2222_v35 }
0x1230   :  { %v2226_v36 = vpop.eup %2225  ;;  %2227 = vrcp.f32 %v1354_v13  ;;  %v1355_v49 = vadd.f32 1.0, %v2224_v15 }
0x1231   :  { %2229 = vrcp.f32 %v1356_v16  ;;  %v1357_v28 = vadd.f32 1.0, %v2226_v36 }
0x1232   :  { %2231 = vrcp.f32 %v1355_v49 }
0x1233   :  { %2233 = vrcp.f32 %v1357_v28 }
0x123a   :  { %v2228_v51 = vpop.eup %2227 }
0x123b   :  { %v2230_v39 = vpop.eup %2229  ;;  %v1370_v9 = vmul.f32 %v2228_v51, %v2835_v37 }
0x123c   :  { %v2232_v20 = vpop.eup %2231  ;;  %v1371_v61 = vmul.f32 %v2230_v39, %v2840_v41 }
0x123d   :  { %v2234_v58 = vpop.eup %2233  ;;  %v1404_v48 = vmul.f32 %v2232_v20, %v2842_v45 }
0x123e   :  { %v1405_v50 = vmul.f32 %v2234_v58, %v2847_v59 }
0x129b   :  { %v1375_v38 = vpop.permute.xlu0 %1374 }
0x129c   :  { %v1380_v30 = vmul.f32 %v2228_v51, %v1375_v38 }
0x129d   :  { %v1377_v43 = vpop.permute.xlu1 %1376 }
0x129e   :  { %1384 = vrot.lane.b32.xlu0 %v1380_v30, %s2310_s25  ;;  %v1381_v4 = vmul.f32 %v2230_v39, %v1377_v43 }
0x129f   :  { %v1409_v18 = vpop.permute.xlu0 %1408 }
0x12a0   :  { %v1414_v8 = vmul.f32 %v2232_v20, %v1409_v18  ;;  %1386 = vrot.lane.b32.xlu1 %v1381_v4, %s2310_s25 }
0x12a1   :  { %v1411_v60 = vpop.permute.xlu1 %1410 }
0x12a2   :  { %1418 = vrot.lane.b32.xlu0 %v1414_v8, %s2310_s25  ;;  %v1415_v29 = vmul.f32 %v2234_v58, %v1411_v60 }
0x12a4   :  { %1420 = vrot.lane.b32.xlu1 %v1415_v29, %s2310_s25 }
0x1310   :  { %v1385_v10 = vpop.permute.xlu0 %1384 }
0x1311   :  { %v2887_v12 = vadd.f32 %v1385_v10, %v1370_v9 }
0x1312   :  { %v1387_v63 = vpop.permute.xlu1 %1386 }
0x1313   :  { %2235 = vtanh.f32 %v2887_v12  ;;  %v2892_v6 = vadd.f32 %v1387_v63, %v1371_v61 }
0x1314   :  { %v1419_v44 = vpop.permute.xlu0 %1418 }
0x1315   :  { %v2894_v0 = vadd.f32 %v1419_v44, %v1404_v48  ;;  %2237 = vtanh.f32 %v2892_v6 }
0x1316   :  { %v1421_v37 = vpop.permute.xlu1 %1420 }
0x1317   :  { %2239 = vtanh.f32 %v2894_v0  ;;  %v2899_v46 = vadd.f32 %v1421_v37, %v1405_v50 }
0x1319   :  { %2241 = vtanh.f32 %v2899_v46 }
0x131d   :  { %v2236_v41 = vpop.eup %2235 }
0x131e   :  { %1396 = vrot.lane.b32.xlu0 %v2236_v41, %s2311_s17 }
0x131f   :  { %v2238_v45 = vpop.eup %2237 }
0x1320   :  { %1398 = vrot.lane.b32.xlu1 %v2238_v45, %s2311_s17 }
0x1321   :  { %v2240_v1 = vpop.eup %2239 }
0x1322   :  { %1430 = vrot.lane.b32.xlu0 %v2240_v1, %s2311_s17 }
0x1323   :  { %v2242_v3 = vpop.eup %2241 }
0x1324   :  { %1432 = vrot.lane.b32.xlu1 %v2242_v3, %s2311_s17 }
0x1390   :  { %v1397_v59 = vpop.permute.xlu0 %1396 }
0x1391   :  { %v1402_v11 = vmul.f32 %v2228_v51, %v1397_v59 }
0x1392   :  { %v1399_v24 = vpop.permute.xlu1 %1398 }
0x1393   :  { %v1403_v14 = vmul.f32 %v2230_v39, %v1399_v24 }
0x1394   :  { %v1431_v17 = vpop.permute.xlu0 %1430 }
0x1395   :  { %v1996_v62 = vpack.i.bf16 %v1403_v14, %v1402_v11  ;;  %v1436_v40 = vmul.f32 %v2232_v20, %v1431_v17 }
0x1396   :  { %v1433_v21 = vpop.permute.xlu1 %1432 }
0x1397   :  { %v1437_v42 = vmul.f32 %v2234_v58, %v1433_v21  ;;  %1997 = vrot.lane.b32.xlu0 %v1996_v62, %s2310_s25 }
0x1399   :  { %v2001_v56 = vpack.i.bf16 %v1437_v42, %v1436_v40 }
0x139b   :  { %2002 = vrot.lane.b32.xlu1 %v2001_v56, %s2311_s17 }
0x1409   :  { %v1998_v19 = vpop.permute.xlu0 %1997 }
0x140a   :  { %v2000_v23 = vunpack.i.h.bf16 %v1998_v19  ;;  %v1999_v27 = vunpack.i.l.bf16 %v1998_v19 }
0x140d   :  { %v2003_v2 = vpop.permute.xlu1 %2002 }
0x140e   :  { %v2005_v47 = vunpack.i.h.bf16 %v2003_v2  ;;  %v2004_v53 = vunpack.i.l.bf16 %v2003_v2 }
0x1410   :  { %v1455_v57 = vsel %vm276_vm1, %v2000_v23, %v2005_v47  ;;  %v1454_v55 = vsel %vm276_vm1, %v1999_v27, %v2004_v53 }
0x1411   :  { %v1456_v5 = vpack.c.bf16 %v1455_v57, %v1454_v55 }
0x1413   :  { %1880 = vmatmul.mubr.msk.bf16.vlgmr.msra.gmra.mrb[16].mxu1 %vm136_vm0, %v1456_v5 }
0x14e6   :  { %v1494_v31 = vpop.f32.mrb[16].mxu1 }
0x14e7   :  { %v1505_v32 = vadd.f32 %v2617_v52, %v1494_v31  ;;  %v1496_v7 = vpop.f32.mrb[17].mxu1 }
0x14e8   :  { %v1498_v33 = vpop.f32.mrb[18].mxu1  ;;  %v1503_v13 = vadd.f32 %v2873_v25, %v1496_v7 }
0x14e9   :  { %v1507_v26 = vadd.f32 %v2819_v22, %v1505_v32  ;;  %v1506_v34 = vadd.f32 %v2621_v54, %v1498_v33  ;;  %v1500_v35 = vpop.f32.mrb[19].mxu1 }
0x14ea   :  { %v1504_v16 = vadd.f32 %v2873_v25, %v1500_v35 }
0x14eb   :  { %2243 = vtanh.f32 %v1507_v26  ;;  %v1508_v15 = vadd.f32 %v2819_v22, %v1506_v34  ;;  %v1881_v28 = vmul.f32 -1.442695, %v1507_v26  ;;  %v1882_v22 = vmul.f32 -1.442695, %v1503_v13 }
0x14ec   :  { %v1884_v38 = vmul.f32 -1.442695, %v1504_v16 }
0x14ed   :  { %2245 = vtanh.f32 %v1508_v15  ;;  %v1883_v51 = vmul.f32 -1.442695, %v1508_v15 }
0x14ee   :  { %2247 = vtanh.f32 %v1503_v13 }
0x14ef   :  { %2249 = vtanh.f32 %v1504_v16 }
0x14f0   :  { %2251 = vpow2.f32 %v1881_v28 }
0x14f1   :  { %2253 = vpow2.f32 %v1883_v51 }
0x14f2   :  { %2255 = vpow2.f32 %v1882_v22 }
0x14f3   :  { %2257 = vpow2.f32 %v1884_v38 }
0x14f5   :  { %v2244_v36 = vpop.eup %2243 }
0x14f6   :  { %1541 = vrot.lane.b32.xlu0 %v2244_v36, %s2311_s17 }
0x14f7   :  { %v2246_v52 = vpop.eup %2245 }
0x14f8   :  { %v2248_v49 = vpop.eup %2247  ;;  %1543 = vrot.lane.b32.xlu1 %v2246_v52, %s2311_s17 }
0x14f9   :  { %v2250_v54 = vpop.eup %2249 }
0x14fa   :  { %1575 = vrot.lane.b32.xlu0 %v2248_v49, %s2311_s17  ;;  %v2252_v30 = vpop.eup %2251 }
0x14fb   :  { %v2254_v39 = vpop.eup %2253  ;;  %v1521_v43 = vadd.f32 1.0, %v2252_v30 }
0x14fc   :  { %1577 = vrot.lane.b32.xlu1 %v2250_v54, %s2311_s17  ;;  %v2256_v20 = vpop.eup %2255  ;;  %v1523_v4 = vadd.f32 1.0, %v2254_v39 }
0x14fd   :  { %v2258_v18 = vpop.eup %2257  ;;  %2259 = vrcp.f32 %v1521_v43  ;;  %v1522_v8 = vadd.f32 1.0, %v2256_v20 }
0x14fe   :  { %2261 = vrcp.f32 %v1523_v4  ;;  %v1524_v58 = vadd.f32 1.0, %v2258_v18 }
0x14ff   :  { %2263 = vrcp.f32 %v1522_v8 }
0x1500   :  { %2265 = vrcp.f32 %v1524_v58 }
0x1507   :  { %v2260_v60 = vpop.eup %2259 }
0x1508   :  { %v2262_v10 = vpop.eup %2261  ;;  %v1537_v1 = vmul.f32 %v2260_v60, %v2887_v12 }
0x1509   :  { %v2264_v63 = vpop.eup %2263  ;;  %v1538_v24 = vmul.f32 %v2262_v10, %v2892_v6 }
0x150a   :  { %v2266_v37 = vpop.eup %2265  ;;  %v1571_v14 = vmul.f32 %v2264_v63, %v2894_v0 }
0x150b   :  { %v1572_v40 = vmul.f32 %v2266_v37, %v2899_v46 }
0x1568   :  { %v1542_v29 = vpop.permute.xlu0 %1541 }
0x1569   :  { %v1547_v9 = vmul.f32 %v2260_v60, %v1542_v29 }
0x156a   :  { %v1544_v61 = vpop.permute.xlu1 %1543 }
0x156b   :  { %1551 = vrot.lane.b32.xlu0 %v1547_v9, %s2310_s25  ;;  %v1548_v48 = vmul.f32 %v2262_v10, %v1544_v61 }
0x156c   :  { %v1576_v44 = vpop.permute.xlu0 %1575 }
0x156d   :  { %v1581_v50 = vmul.f32 %v2264_v63, %v1576_v44  ;;  %1553 = vrot.lane.b32.xlu1 %v1548_v48, %s2310_s25 }
0x156e   :  { %v1578_v41 = vpop.permute.xlu1 %1577 }
0x156f   :  { %1585 = vrot.lane.b32.xlu0 %v1581_v50, %s2310_s25  ;;  %v1582_v45 = vmul.f32 %v2266_v37, %v1578_v41  ;;  %v1892_v50 = vld [vmem:[%s3021_s7] ss:$0 sm:$0xff] }
0x1571   :  { %1587 = vrot.lane.b32.xlu1 %v1582_v45, %s2310_s25 }
0x15dd   :  { %v1552_v3 = vpop.permute.xlu0 %1551 }
0x15de   :  { %v2926_v59 = vadd.f32 %v1552_v3, %v1537_v1 }
0x15df   :  { %v1554_v11 = vpop.permute.xlu1 %1553 }
0x15e0   :  { %2267 = vtanh.f32 %v2926_v59  ;;  %v2931_v17 = vadd.f32 %v1554_v11, %v1538_v24 }
0x15e1   :  { %v1586_v62 = vpop.permute.xlu0 %1585 }
0x15e2   :  { %v2933_v21 = vadd.f32 %v1586_v62, %v1571_v14  ;;  %2269 = vtanh.f32 %v2931_v17  ;;  %v17_v62 = vstv %s3022_s8 }
0x15e3   :  { %v1588_v12 = vpop.permute.xlu1 %1587  ;;  %18 = vst [vmem:[#allocation2] sm:$0x1] %v17_v62 }
0x15e4   :  { %2271 = vtanh.f32 %v2933_v21  ;;  %v2938_v42 = vadd.f32 %v1588_v12, %v1572_v40 }
0x15e6   :  { %2273 = vtanh.f32 %v2938_v42 }
0x15ea   :  { %v2268_v6 = vpop.eup %2267 }
0x15eb   :  { %1563 = vrot.lane.b32.xlu0 %v2268_v6, %s2311_s17  ;;  %v1893_v6 = vld [vmem:[#allocation2] ss:$0 sm:$0xff] }
0x15ec   :  { %v2270_v0 = vpop.eup %2269 }
0x15ed   :  { %1565 = vrot.lane.b32.xlu1 %v2270_v0, %s2311_s17 }
0x15ee   :  { %v2272_v56 = vpop.eup %2271 }
0x15ef   :  { %1597 = vrot.lane.b32.xlu0 %v2272_v56, %s2311_s17 }
0x15f0   :  { %v2274_v19 = vpop.eup %2273 }
0x15f1   :  { %1599 = vrot.lane.b32.xlu1 %v2274_v19, %s2311_s17 }
0x165d   :  { %v1564_v46 = vpop.permute.xlu0 %1563 }
0x165e   :  { %v1569_v2 = vmul.f32 %v2260_v60, %v1564_v46 }
0x165f   :  { %v1566_v23 = vpop.permute.xlu1 %1565 }
0x1660   :  { %1607 = vrot.lane.b32.xlu0 %v1569_v2, %s2310_s25  ;;  %v1570_v27 = vmul.f32 %v2262_v10, %v1566_v23 }
0x1661   :  { %v1598_v47 = vpop.permute.xlu0 %1597 }
0x1662   :  { %1609 = vrot.lane.b32.xlu1 %v1570_v27, %s2310_s25  ;;  %v1603_v57 = vmul.f32 %v2264_v63, %v1598_v47 }
0x1663   :  { %v1600_v53 = vpop.permute.xlu1 %1599 }
0x1664   :  { %v1604_v55 = vmul.f32 %v2266_v37, %v1600_v53 }
0x1666   :  { %v2006_v5 = vpack.i.bf16 %v1604_v55, %v1603_v57 }
0x1668   :  { %2007 = vrot.lane.b32.xlu0 %v2006_v5, %s2311_s17 }
0x16d2   :  { %v1608_v31 = vpop.permute.xlu0 %1607 }
0x16d3   :  { %1718 = vst.msk [vmem:[%s3020_s10] sm:$0xff] %vm276_vm1, %v1608_v31 }
0x16d4   :  { %v1610_v32 = vpop.permute.xlu1 %1609 }
0x16d5   :  { %1719 = vst.msk [vmem:[%s3020_s10 + $0x8] sm:$0xff] %vm276_vm1, %v1610_v32 }
0x16da   :  { %v2008_v7 = vpop.permute.xlu0 %2007 }
0x16db   :  { %v2010_v33 = vunpack.i.h.bf16 %v2008_v7  ;;  %v2009_v26 = vunpack.i.l.bf16 %v2008_v7 }
0x16dd   :  { %v1621_v34 = vsel %vm276_vm1, %v1608_v31, %v2009_v26  ;;  %v1622_v35 = vsel %vm276_vm1, %v1610_v32, %v2010_v33 }
0x16de   :  { %v1623_v13 = vpack.c.bf16 %v1622_v35, %v1621_v34 }
0x16e0   :  { %1885 = vmatmul.mubr.msk.bf16.vlgmr.msra.gmra.mrb[28].mxu0 %vm136_vm0, %v1623_v13 }
0x17b3   :  { %v1661_v15 = vpop.f32.mrb[28].mxu0 }
0x17b4   :  { %v1662_v16 = vpop.f32.mrb[29].mxu0 }
0x17b5   :  { %v1668_v36 = vadd.f32 %v2873_v25, %v1662_v16  ;;  %v1664_v52 = vpop.f32.mrb[30].mxu0 }
0x17b6   :  { %v1665_v49 = vpop.f32.mrb[31].mxu0 }
0x17b7   :  { %2275 = vtanh.f32 %v1668_v36  ;;  %v1669_v54 = vadd.f32 %v2873_v25, %v1665_v49  ;;  %v1886_v22 = vmul.f32 -1.442695, %v1668_v36 }
0x17b9   :  { %2277 = vtanh.f32 %v1669_v54  ;;  %v1887_v38 = vmul.f32 -1.442695, %v1669_v54 }
0x17ba   :  { %2279 = vpow2.f32 %v1886_v22 }
0x17bb   :  { %2281 = vpow2.f32 %v1887_v38 }
0x17c1   :  { %v2276_v28 = vpop.eup %2275 }
0x17c2   :  { %1688 = vrot.lane.b32.xlu1 %v2276_v28, %s2311_s17 }
0x17c3   :  { %v2278_v51 = vpop.eup %2277 }
0x17c4   :  { %1690 = vrot.lane.b32.xlu0 %v2278_v51, %s2311_s17  ;;  %v2280_v30 = vpop.eup %2279 }
0x17c5   :  { %v2282_v39 = vpop.eup %2281  ;;  %v1676_v43 = vadd.f32 1.0, %v2280_v30 }
0x17c6   :  { %v1677_v20 = vadd.f32 1.0, %v2282_v39 }
0x17c7   :  { %2283 = vrcp.f32 %v1676_v43 }
0x17c8   :  { %2285 = vrcp.f32 %v1677_v20 }
0x17d1   :  { %v2284_v4 = vpop.eup %2283 }
0x17d2   :  { %v2286_v8 = vpop.eup %2285  ;;  %v1684_v29 = vmul.f32 %v2284_v4, %v2933_v21 }
0x17d3   :  { %v1685_v61 = vmul.f32 %v2286_v8, %v2938_v42 }
0x1834   :  { %v1689_v18 = vpop.permute.xlu1 %1688 }
0x1835   :  { %v1694_v25 = vmul.f32 %v2284_v4, %v1689_v18 }
0x1836   :  { %v1691_v58 = vpop.permute.xlu0 %1690 }
0x1837   :  { %1698 = vrot.lane.b32.xlu1 %v1694_v25, %s2310_s25  ;;  %v1695_v60 = vmul.f32 %v2286_v8, %v1691_v58 }
0x1839   :  { %1700 = vrot.lane.b32.xlu0 %v1695_v60, %s2310_s25 }
0x18a9   :  { %v1699_v9 = vpop.permute.xlu1 %1698 }
0x18aa   :  { %v1704_v10 = vadd.f32 %v1699_v9, %v1684_v29 }
0x18ab   :  { %v1701_v63 = vpop.permute.xlu0 %1700 }
0x18ac   :  { %2287 = vtanh.f32 %v1704_v10  ;;  %v1705_v48 = vadd.f32 %v1701_v63, %v1685_v61 }
0x18ae   :  { %2289 = vtanh.f32 %v1705_v48 }
0x18b6   :  { %v2288_v44 = vpop.eup %2287 }
0x18b7   :  { %1710 = vrot.lane.b32.xlu1 %v2288_v44, %s2311_s17 }
0x18b8   :  { %v2290_v37 = vpop.eup %2289 }
0x18b9   :  { %1712 = vrot.lane.b32.xlu0 %v2290_v37, %s2311_s17 }
0x18bb   :  { %1758 = vrot.lane.b32.xlu1 %v1892_v50, %s2312_s21 }
0x1929   :  { %v1711_v41 = vpop.permute.xlu1 %1710 }
0x192a   :  { %v1716_v45 = vmul.f32 %v2284_v4, %v1711_v41 }
0x192b   :  { %v1713_v1 = vpop.permute.xlu0 %1712 }
0x192c   :  { %v1717_v3 = vmul.f32 %v2286_v8, %v1713_v1 }
0x192d   :  { %v1759_v24 = vpop.permute.xlu1 %1758 }
0x192e   :  { %v1761_v11 = vmul.f32 %v1759_v24, %v1716_v45  ;;  %v1762_v14 = vmul.f32 %v1759_v24, %v1717_v3 }
0x1930   :  { %1765 = vrot.lane.b32.xlu0 %v1761_v11, %s2310_s25  ;;  %1767 = vrot.lane.b32.xlu1 %v1762_v14, %s2310_s25 }
0x19a2   :  { %v1766_v21 = vpop.permute.xlu0 %1765  ;;  %v1768_v40 = vpop.permute.xlu1 %1767 }
0x19a3   :  { %v1771_v12 = vsel %vm276_vm1, %v1766_v21, 0.0  ;;  %v1774_v42 = vsel %vm276_vm1, %v1768_v40, 0.0 }
0x19a4   :  { %1772 = vadd.xlane.f32.xlu0 %v1771_v12  ;;  %1775 = vadd.xlane.f32.xlu1 %v1774_v42 }
0x19b5   :  { %1724 = vrot.lane.b32.xlu1 %v1717_v3, %s2310_s25 }
0x19b9   :  { %1735 = vrot.lane.b32.xlu1 %v2931_v17, %s2312_s21 }
0x19ba   :  { %1722 = vrot.lane.b32.xlu0 %v1716_v45, %s2310_s25 }
0x19bd   :  { %1745 = vrot.lane.b32.xlu1 %v1705_v48, %s2312_s21 }
0x19be   :  { %1733 = vrot.lane.b32.xlu0 %v2926_v59, %s2312_s21 }
0x19c2   :  { %1743 = vrot.lane.b32.xlu0 %v1704_v10, %s2312_s21 }
0x1a31   :  { %v1773_v0 = vpop.xlane.xlu0 %1772  ;;  %v1776_v56 = vpop.xlane.xlu1 %1775 }
0x1a32   :  { %v1784_v19 = vadd.f32 %v1893_v6, %v1773_v0  ;;  %v1785_v46 = vadd.f32 %v1893_v6, %v1776_v56 }
0x1a34   :  { %v1894_v2 = vmul.f32 -1.442695, %v1784_v19  ;;  %v1895_v23 = vmul.f32 -1.442695, %v1785_v46 }
0x1a35   :  { %v1723_v27 = vpop.permute.xlu0 %1722  ;;  %v1725_v47 = vpop.permute.xlu1 %1724 }
0x1a36   :  { %2291 = vpow2.f32 %v1894_v2  ;;  %1888 = vst.msk [vmem:[%s3020_s10 + $0x10] sm:$0xff] %vm276_vm1, %v1723_v27  ;;  %1889 = vst.msk [vmem:[%s3020_s10 + $0x18] sm:$0xff] %vm276_vm1, %v1725_v47 }
0x1a37   :  { %2293 = vpow2.f32 %v1895_v23 }
0x1a39   :  { %v1734_v59 = vpop.permute.xlu0 %1733  ;;  %v1736_v17 = vpop.permute.xlu1 %1735 }
0x1a3a   :  { %1739 = vst.msk [vmem:[%s3023_s11] sm:$0xff] %vm276_vm1, %v1734_v59  ;;  %1740 = vst.msk [vmem:[%s3023_s11 + $0x8] sm:$0xff] %vm276_vm1, %v1736_v17 }
0x1a3d   :  { %v1744_v53 = vpop.permute.xlu0 %1743  ;;  %v1746_v57 = vpop.permute.xlu1 %1745 }
0x1a3e   :  { %1890 = vst.msk [vmem:[%s3023_s11 + $0x10] sm:$0xff] %vm276_vm1, %v1744_v53  ;;  %1891 = vst.msk [vmem:[%s3023_s11 + $0x18] sm:$0xff] %vm276_vm1, %v1746_v57 }
0x1a40   :  { %v2292_v55 = vpop.eup %2291 }
0x1a41   :  { %v2294_v5 = vpop.eup %2293  ;;  %v1792_v31 = vadd.f32 1.0, %v2292_v55 }
0x1a42   :  { %v1793_v32 = vadd.f32 1.0, %v2294_v5 }
0x1a43   :  { %2295 = vrcp.f32 %v1792_v31 }
0x1a44   :  { %2297 = vrcp.f32 %v1793_v32 }
0x1a4d   :  { %v2296_v7 = vpop.eup %2295 }
0x1a4e   :  { %v2298_v33 = vpop.eup %2297  ;;  %1799 = vst.msk [vmem:[%s3024_s9] sm:$0xff] %vm1798_vm2, %v2296_v7 }
0x1a4f   :  { %1800 = vst.msk [vmem:[%s3024_s9 + $0x8] sm:$0xff] %vm1798_vm2, %v2298_v33 }

</bundles_post_ra>
